<compile_context>
chip_gen: v6e
topology: v6e:2x2x1
jax: 0.10.0
libtpu: 0.0.40
codegen_flags: <defaults>
</compile_context>

<pallas_src>
import functools

import jax
import jax.numpy as jnp
from jax.experimental import pallas as pl
from jax.experimental.pallas import tpu as pltpu


def conv_bn_relu_kernel(x_ref, w_ref, gb_ref, o_ref, *, m_true, eps):
    # x_ref: (Cin, M)   w_ref: (Cb, Cin)   gb_ref: (Cb, 2)   o_ref: (Cb, M)
    x = x_ref[...]
    w = w_ref[...]
    gb = gb_ref[...]

    # 1x1 conv == GEMM on the MXU:  y[c, m] = sum_k W[c, k] * x[k, m]
    y = jnp.dot(w, x, preferred_element_type=jnp.float32)          # (Cb, M)

    # Training-mode BatchNorm2d statistics over the N*H*W axis (lanes).
    # Two-pass variance for parity with PyTorch's batch variance.
    inv_m = 1.0 / float(m_true)
    mean = jnp.sum(y, axis=-1, keepdims=True) * inv_m               # (Cb, 1)
    centered = y - mean
    var = jnp.sum(centered * centered, axis=-1, keepdims=True) * inv_m
    inv_std = jax.lax.rsqrt(var + eps)

    # Fold BN affine into one per-row scale/shift -> single FMA + ReLU epilogue.
    scale = inv_std * gb[:, 0:1]                                    # (Cb, 1)
    shift = gb[:, 1:2]                                              # (Cb, 1)
    o_ref[...] = jnp.maximum(centered * scale + shift, 0.0)


def prepare_params(weight, gamma, beta):
    """Prepare conv weight / BN affine params once (outside the hot path).

    weight: (Cout, Cin) f32 (squeezed 1x1 conv kernel).
    Returns (w2d, gb) where gb packs gamma/beta as a (Cout, 2) array.
    """
    w2d = weight.astype(jnp.float32)
    gb = jnp.stack(
        [gamma.astype(jnp.float32), beta.astype(jnp.float32)], axis=-1
    )  # (Cout, 2)
    return w2d, gb


@functools.partial(jax.jit, static_argnames=("eps", "num_cout_blocks"))
def conv2d_bn_relu(x_nchw, w2d, gb, *, eps=1e-5, num_cout_blocks=2):
    """x_nchw: (N, Cin, H, W) f32.  w2d: (Cout, Cin).  gb: (Cout, 2)."""
    n, cin, h, w = x_nchw.shape
    m_true = n * h * w
    cout = w2d.shape[0]
    assert cout % num_cout_blocks == 0 and (cout // num_cout_blocks) % 8 == 0
    cb = cout // num_cout_blocks

    # N == 1 (the module's shape): NCHW -> (Cin, H*W) is a pure reshape,
    # so no activation transpose is needed before or after the kernel.
    if n == 1:
        x2d = x_nchw.reshape(cin, m_true)
    else:  # general fallback (not the hot path for this module)
        x2d = jnp.transpose(x_nchw, (1, 0, 2, 3)).reshape(cin, m_true)

    kernel = functools.partial(conv_bn_relu_kernel, m_true=m_true, eps=eps)

    flops = 2 * cout * cin * m_true
    bytes_accessed = 4 * (cin * m_true + cout * cin + cout * 2 + cout * m_true)

    out2d = pl.pallas_call(
        kernel,
        out_shape=jax.ShapeDtypeStruct((cout, m_true), jnp.float32),
        grid=(num_cout_blocks,),
        in_specs=[
            # x: full (Cin, M) block, identical for every grid step (not re-fetched).
            pl.BlockSpec((cin, m_true), lambda i: (0, 0)),
            # weight: split along Cout across grid steps.
            pl.BlockSpec((cb, cin), lambda i: (i, 0)),
            # packed gamma/beta: split along Cout across grid steps.
            pl.BlockSpec((cb, 2), lambda i: (i, 0)),
        ],
        out_specs=pl.BlockSpec((cb, m_true), lambda i: (i, 0)),
        compiler_params=pltpu.CompilerParams(
            dimension_semantics=("parallel",)
        ),
        cost_estimate=pl.CostEstimate(
            flops=flops, transcendentals=cout, bytes_accessed=bytes_accessed
        ),
    )(x2d, w2d, gb)

    if n == 1:
        return out2d.reshape(1, cout, h, w)
    return jnp.transpose(out2d.reshape(cout, n, h, w), (1, 0, 2, 3))


def _reference(x_nchw, weight, gamma, beta, eps=1e-5):
    # Pure-JAX reference of conv1x1 + training-mode BN + ReLU.
    n, cin, h, w = x_nchw.shape
    x2d = jnp.transpose(x_nchw, (0, 2, 3, 1)).reshape(-1, cin)
    y = jnp.dot(x2d, weight.T, precision=jax.lax.Precision.HIGHEST)
    mean = jnp.mean(y, axis=0, keepdims=True)
    var = jnp.mean((y - mean) ** 2, axis=0, keepdims=True)
    out = (y - mean) / jnp.sqrt(var + eps) * gamma + beta
    out = jnp.maximum(out, 0.0)
    return jnp.transpose(out.reshape(n, h, w, -1), (0, 3, 1, 2))


if __name__ == "__main__":
    key = jax.random.PRNGKey(0)
    k_x, k_w, k_g, k_b = jax.random.split(key, 4)

    # Shapes implied by the module's forward: (1, 336, 14, 14).
    N, C, H, W = 1, 336, 14, 14
    x = jax.random.normal(k_x, (N, C, H, W), jnp.float32)

    # Conv2d(336, 336, 1x1, bias=False): weight (Cout, Cin, 1, 1) -> squeezed (Cout, Cin)
    weight = jax.random.normal(k_w, (C, C), jnp.float32) * (1.0 / jnp.sqrt(C))
    # BatchNorm2d affine parameters
    gamma = 1.0 + 0.1 * jax.random.normal(k_g, (C,), jnp.float32)
    beta = 0.1 * jax.random.normal(k_b, (C,), jnp.float32)

    w2d, gb = prepare_params(weight, gamma, beta)

    out = conv2d_bn_relu(x, w2d, gb, eps=1e-5, num_cout_blocks=2)
    out = jax.block_until_ready(out)

    ref = _reference(x, weight, gamma, beta)
    assert out.shape == (N, C, H, W)
    assert jnp.allclose(out, ref, atol=1e-3, rtol=1e-3), "mismatch vs reference"

    print("KERNEL_OK")
</pallas_src>

<mosaic_0001>
module attributes {stable_mosaic.version = 11 : i64} {
  func.func @conv_bn_relu_kernel(%arg0: i32, %arg1: memref<336x196xf32, #tpu.memory_space<vmem>>, %arg2: memref<168x336xf32, #tpu.memory_space<vmem>>, %arg3: memref<168x2xf32, #tpu.memory_space<vmem>>, %arg4: memref<168x196xf32, #tpu.memory_space<vmem>>) attributes {dimension_semantics = [#tpu.dimension_semantics<parallel>], iteration_bounds = array<i64: 2>, scalar_prefetch = 0 : i64, scratch_operands = 0 : i64, tpu.core_type = #tpu.core_type<tc>, window_params = [{pipeline_mode = #tpu.pipeline_mode<synchronous>, transform_indices = @transform_0, window_bounds = array<i64: 336, 196>}, {transform_indices = @transform_1, window_bounds = array<i64: 168, 336>}, {transform_indices = @transform_2, window_bounds = array<i64: 168, 2>}, {transform_indices = @transform_3, window_bounds = array<i64: 168, 196>}]} {
    %c0 = arith.constant 0 : index
    %c0_0 = arith.constant 0 : index
    %0 = vector.load %arg1[%c0, %c0_0] : memref<336x196xf32, #tpu.memory_space<vmem>>, vector<336x196xf32>
    %c0_1 = arith.constant 0 : index
    %c0_2 = arith.constant 0 : index
    %1 = vector.load %arg2[%c0_1, %c0_2] : memref<168x336xf32, #tpu.memory_space<vmem>>, vector<168x336xf32>
    %c0_3 = arith.constant 0 : index
    %c0_4 = arith.constant 0 : index
    %2 = vector.load %arg3[%c0_3, %c0_4] : memref<168x2xf32, #tpu.memory_space<vmem>>, vector<168x2xf32>
    %cst = arith.constant dense<0.000000e+00> : vector<168x196xf32>
    %3 = tpu.matmul %1, %0, %cst {dimension_numbers = #tpu.dot_dimension_numbers<[1], [0], [0], [1], [0, 0, 1, 1], [], []>} : vector<168x336xf32>, vector<336x196xf32>, vector<168x196xf32> -> vector<168x196xf32>
    %cst_5 = arith.constant dense<0.000000e+00> : vector<168xf32>
    %4 = vector.multi_reduction <add>, %3, %cst_5 [1] : vector<168x196xf32> to vector<168xf32>
    %5 = vector.shape_cast %4 : vector<168xf32> to vector<168x1xf32>
    %cst_6 = arith.constant 0.00510204071 : f32
    %6 = vector.broadcast %cst_6 : f32 to vector<168x1xf32>
    %7 = arith.mulf %5, %6 : vector<168x1xf32>
    %8 = vector.broadcast %7 : vector<168x1xf32> to vector<168x196xf32>
    %9 = arith.subf %3, %8 : vector<168x196xf32>
    %10 = arith.mulf %9, %9 : vector<168x196xf32>
    %cst_7 = arith.constant dense<0.000000e+00> : vector<168xf32>
    %11 = vector.multi_reduction <add>, %10, %cst_7 [1] : vector<168x196xf32> to vector<168xf32>
    %12 = vector.shape_cast %11 : vector<168xf32> to vector<168x1xf32>
    %cst_8 = arith.constant 0.00510204071 : f32
    %13 = vector.broadcast %cst_8 : f32 to vector<168x1xf32>
    %14 = arith.mulf %12, %13 : vector<168x1xf32>
    %cst_9 = arith.constant 9.99999974E-6 : f32
    %15 = vector.broadcast %cst_9 : f32 to vector<168x1xf32>
    %16 = arith.addf %14, %15 : vector<168x1xf32>
    %17 = math.rsqrt %16 : vector<168x1xf32>
    %18 = vector.extract_strided_slice %2 {offsets = [0, 0], sizes = [168, 1], strides = [1, 1]} : vector<168x2xf32> to vector<168x1xf32>
    %19 = arith.mulf %17, %18 : vector<168x1xf32>
    %20 = vector.extract_strided_slice %2 {offsets = [0, 1], sizes = [168, 1], strides = [1, 1]} : vector<168x2xf32> to vector<168x1xf32>
    %21 = vector.broadcast %19 : vector<168x1xf32> to vector<168x196xf32>
    %22 = arith.mulf %9, %21 : vector<168x196xf32>
    %23 = vector.broadcast %20 : vector<168x1xf32> to vector<168x196xf32>
    %24 = arith.addf %22, %23 : vector<168x196xf32>
    %cst_10 = arith.constant 0.000000e+00 : f32
    %25 = vector.broadcast %cst_10 : f32 to vector<168x196xf32>
    %26 = arith.maximumf %24, %25 : vector<168x196xf32>
    %c0_11 = arith.constant 0 : index
    %c0_12 = arith.constant 0 : index
    %27 = vector.load %arg4[%c0_11, %c0_12] : memref<168x196xf32, #tpu.memory_space<vmem>>, vector<168x196xf32>
    tpu.vector_store %arg4[%c0_11, %c0_12], %26 {strides = array<i32>} : memref<168x196xf32, #tpu.memory_space<vmem>>, vector<168x196xf32>,
    return
  }
  func.func @transform_0(%arg0: i32) -> (i32, i32) {
    %c0_i32 = arith.constant 0 : i32
    %c0_i32_0 = arith.constant 0 : i32
    %c0_i32_1 = arith.constant 0 : i32
    return %c0_i32, %c0_i32_0 : i32, i32
  }
  func.func @transform_1(%arg0: i32) -> (i32, i32) {
    %c0_i32 = arith.constant 0 : i32
    %c0_i32_0 = arith.constant 0 : i32
    return %arg0, %c0_i32 : i32, i32
  }
  func.func @transform_2(%arg0: i32) -> (i32, i32) {
    %c0_i32 = arith.constant 0 : i32
    %c0_i32_0 = arith.constant 0 : i32
    return %arg0, %c0_i32 : i32, i32
  }
  func.func @transform_3(%arg0: i32) -> (i32, i32) {
    %c0_i32 = arith.constant 0 : i32
    %c0_i32_0 = arith.constant 0 : i32
    return %arg0, %c0_i32 : i32, i32
  }
}

</mosaic_0001>

<bundles_post_ra>
// kernel: conv2d_bn_relu.1
= control target key start
LH: loop header
LB: loop body
LE: loop exit
PB: predicated region body
PF: predicated region fallthrough
CT: control target
= control target key end

     0   :  { %s1748_s12 = smov 0   ;;  %s2828_s0 = inlined_call_operand.vmem [shape: f32[336,196], index: 0, kind: input, shape index: {}]   ;;  %s2829_s1 = inlined_call_operand.vmem [shape: f32[336,336], index: 1, kind: input, shape index: {}]   ;;  %s2830_s2 = inlined_call_operand.vmem [shape: f32[336,2], index: 2, kind: input, shape index: {}]   ;;  %s2831_s3 = inlined_call_operand.vmem [shape: f32[336,196], index: 3, kind: output, shape index: {}]  }
   0x1 LB: > { %s1621_s13 = sadd.s32 4294967295, %s1723_s12   ;;  %p1625_p0 = scmp.ge.s32.totalorder %s1723_s12, 1  ;;  %s1723_s12 = sphi %s1748_s12, %s13_s12  }
   0x2   : > { %p150_p1 = scmp.lt.s32.totalorder %s1723_s12, 3 }
   0x4   : > { %p151_p2 = pnand %p1625_p0, %p150_p1 }
   0x6   : > { %154 = sbr.rel (%p151_p2) target bundleno = 864 (0x360), region = 32 }
   0xb   : > { %v232_v0 = vld [vmem:[%s2828_s0 + $0xf8] sm:$0xff]  ;;  %v231_v1 = vld [vmem:[%s2828_s0 + $0xf0] sm:$0xff]  ;;  %v230_v2 = vld [vmem:[%s2828_s0 + $0xe8] sm:$0xff]  ;;  %v1725_v4 = vmov 0.0   ;;  %s1807_s21 = smul.u32 21, %s1621_s13  ;;  %vm369_vm0 = vcmask 654336  }
   0xc   : > { %433 = vmatprep.subr.mxu0 %v232_v0  ;;  %v229_v3 = vld [vmem:[%s2828_s0 + $0xe0] sm:$0xff]  ;;  %688 = vmatprep.mubr.f32.mxu1 %v1725_v4  ;;  %v228_v5 = vld [vmem:[%s2828_s0 + $0xd8] sm:$0xff]  ;;  %v227_v6 = vld [vmem:[%s2828_s0 + $0xd0] sm:$0xff]  ;;  %vm815_vm1 = vcmask 556032  }
   0xd   : > { %434 = vmatpush1.msra.mxu0 %v231_v1  ;;  %v226_v7 = vld [vmem:[%s2828_s0 + $0xc8] sm:$0xff]  ;;  %v225_v8 = vld [vmem:[%s2828_s0 + $0xc0] sm:$0xff]  ;;  %v224_v9 = vld [vmem:[%s2828_s0 + $0xb8] sm:$0xff]  ;;  %p182_p3 = scmp.lt.s32.totalorder %s1807_s21, 41  ;;  %v2832_v1 = vmov 1  }
   0xe   : > { %435 = vmatprep.subr.mxu0 %v230_v2  ;;  %v223_v10 = vld [vmem:[%s2828_s0 + $0xb0] sm:$0xff]  ;;  %v222_v11 = vld [vmem:[%s2828_s0 + $0xa8] sm:$0xff]  ;;  %v221_v12 = vld [vmem:[%s2828_s0 + $0xa0] sm:$0xff]  ;;  %1667 = vset.pattern.permute.xlu1 %v2832_v1 }
   0xf   : > { %436 = vmatpush1.msra.mxu0 %v229_v3  ;;  %v220_v13 = vld [vmem:[%s2828_s0 + $0x98] sm:$0xff]  ;;  %v219_v14 = vld [vmem:[%s2828_s0 + $0x90] sm:$0xff]  ;;  %v218_v15 = vld [vmem:[%s2828_s0 + $0x88] sm:$0xff]  ;;  %s2887_s21 = smov (!%p182_p3, %s1807_s21), 41  ;;  %1666 = vset.pattern.permute.xlu0 %v2832_v1 }
  0x10   : > { %437 = vmatprep.subr.mxu0 %v228_v5  ;;  %v217_v16 = vld [vmem:[%s2828_s0 + $0x80] sm:$0xff]  ;;  %v216_v17 = vld [vmem:[%s2828_s0 + $0x78] sm:$0xff]  ;;  %v215_v19 = vld [vmem:[%s2828_s0 + $0x70] sm:$0xff]  ;;  %s1654_s24 = smul.u32 24, %s2887_s21  ;;  %s1627_s27 = sshll.u32 %s2887_s21, 3 }
  0x11   : > { %438 = vmatpush1.msra.mxu0 %v227_v6  ;;  %v284_v18 = vld [vmem:[%s2828_s0 + $0x298] sm:$0xff]  ;;  %v283_v20 = vld [vmem:[%s2828_s0 + $0x290] sm:$0xff]  ;;  %v282_v21 = vld [vmem:[%s2828_s0 + $0x288] sm:$0xff]  ;;  %s1997_s8 = scalar_lea.vmem %s2830_s2, %s1627_s27 }
  0x12   : > { %439 = vmatprep.subr.mxu0 %v226_v7  ;;  %636 = vmatprep.subr.mxu1 %v284_v18  ;;  %v214_v22 = vld [vmem:[%s2828_s0 + $0x68] sm:$0xff]  ;;  %v281_v23 = vld [vmem:[%s2828_s0 + $0x280] sm:$0xff]  ;;  %v280_v25 = vld [vmem:[%s2828_s0 + $0x278] sm:$0xff]  ;;  %s1921_s17 = scalar_lea.vmem %s2829_s1, %s1654_s24 }
  0x13   : > { %440 = vmatpush1.msra.mxu0 %v225_v8  ;;  %637 = vmatpush1.msra.mxu1 %v283_v20  ;;  %v213_v24 = vld [vmem:[%s2828_s0 + $0x60] sm:$0xff]  ;;  %v279_v26 = vld [vmem:[%s2828_s0 + $0x270] sm:$0xff]  ;;  %v212_v27 = vld [vmem:[%s2828_s0 + $0x58] sm:$0xff] }
  0x14   : > { %441 = vmatprep.subr.mxu0 %v224_v9  ;;  %638 = vmatprep.subr.mxu1 %v282_v21  ;;  %v278_v28 = vld [vmem:[%s2828_s0 + $0x268] sm:$0xff]  ;;  %v211_v29 = vld [vmem:[%s2828_s0 + $0x50] sm:$0xff]  ;;  %v277_v30 = vld [vmem:[%s2828_s0 + $0x260] sm:$0xff] }
  0x15   : > { %442 = vmatpush1.msra.mxu0 %v223_v10  ;;  %639 = vmatpush1.msra.mxu1 %v281_v23  ;;  %v210_v31 = vld [vmem:[%s2828_s0 + $0x48] sm:$0xff]  ;;  %v276_v32 = vld [vmem:[%s2828_s0 + $0x258] sm:$0xff]  ;;  %v209_v33 = vld [vmem:[%s2828_s0 + $0x40] sm:$0xff] }
  0x16   : > { %443 = vmatprep.subr.mxu0 %v222_v11  ;;  %640 = vmatprep.subr.mxu1 %v280_v25  ;;  %v275_v34 = vld [vmem:[%s2828_s0 + $0x250] sm:$0xff]  ;;  %v208_v35 = vld [vmem:[%s2828_s0 + $0x38] sm:$0xff]  ;;  %v274_v36 = vld [vmem:[%s2828_s0 + $0x248] sm:$0xff] }
  0x17   : > { %444 = vmatpush1.msra.mxu0 %v221_v12  ;;  %641 = vmatpush1.msra.mxu1 %v279_v26  ;;  %v207_v37 = vld [vmem:[%s2828_s0 + $0x30] sm:$0xff]  ;;  %v273_v38 = vld [vmem:[%s2828_s0 + $0x240] sm:$0xff]  ;;  %v206_v39 = vld [vmem:[%s2828_s0 + $0x28] sm:$0xff] }
  0x18   : > { %445 = vmatprep.subr.mxu0 %v220_v13  ;;  %642 = vmatprep.subr.mxu1 %v278_v28  ;;  %v272_v40 = vld [vmem:[%s2828_s0 + $0x238] sm:$0xff]  ;;  %v205_v41 = vld [vmem:[%s2828_s0 + $0x20] sm:$0xff]  ;;  %v271_v42 = vld [vmem:[%s2828_s0 + $0x230] sm:$0xff] }
  0x19   : > { %446 = vmatpush1.msra.mxu0 %v219_v14  ;;  %643 = vmatpush1.msra.mxu1 %v277_v30  ;;  %v204_v43 = vld [vmem:[%s2828_s0 + $0x18] sm:$0xff]  ;;  %v270_v44 = vld [vmem:[%s2828_s0 + $0x228] sm:$0xff]  ;;  %v203_v45 = vld [vmem:[%s2828_s0 + $0x10] sm:$0xff] }
  0x1a   : > { %447 = vmatprep.subr.mxu0 %v218_v15  ;;  %644 = vmatprep.subr.mxu1 %v276_v32  ;;  %v269_v46 = vld [vmem:[%s2828_s0 + $0x220] sm:$0xff]  ;;  %v202_v47 = vld [vmem:[%s2828_s0 + $0x8] sm:$0xff]  ;;  %v268_v48 = vld [vmem:[%s2828_s0 + $0x218] sm:$0xff] }
  0x1b   : > { %448 = vmatpush1.msra.mxu0 %v217_v16  ;;  %645 = vmatpush1.msra.mxu1 %v275_v34  ;;  %v201_v49 = vld [vmem:[%s2828_s0] sm:$0xff]  ;;  %v267_v50 = vld [vmem:[%s2828_s0 + $0x210] sm:$0xff]  ;;  %v264_v51 = vld [vmem:[%s2828_s0 + $0x1f8] sm:$0xff] }
  0x1c   : > { %449 = vmatprep.subr.mxu0 %v216_v17  ;;  %646 = vmatprep.subr.mxu1 %v274_v36  ;;  %v266_v52 = vld [vmem:[%s2828_s0 + $0x208] sm:$0xff]  ;;  %v263_v53 = vld [vmem:[%s2828_s0 + $0x1f0] sm:$0xff]  ;;  %v265_v54 = vld [vmem:[%s2828_s0 + $0x200] sm:$0xff] }
  0x1d   : > { %450 = vmatpush1.msra.mxu0 %v215_v19  ;;  %647 = vmatpush1.msra.mxu1 %v273_v38  ;;  %v262_v55 = vld [vmem:[%s2828_s0 + $0x1e8] sm:$0xff]  ;;  %v287_v56 = vld [vmem:[%s1921_s17 + $0x10] sm:$0xff]  ;;  %v261_v57 = vld [vmem:[%s2828_s0 + $0x1e0] sm:$0xff] }
  0x1e   : > { %451 = vmatprep.subr.mxu0 %v214_v22  ;;  %648 = vmatprep.subr.mxu1 %v272_v40  ;;  %v286_v58 = vld [vmem:[%s1921_s17 + $0x8] sm:$0xff]  ;;  %v260_v59 = vld [vmem:[%s2828_s0 + $0x1d8] sm:$0xff]  ;;  %v259_v60 = vld [vmem:[%s2828_s0 + $0x1d0] sm:$0xff] }
  0x1f   : > { %452 = vmatpush1.msra.mxu0 %v213_v24  ;;  %649 = vmatpush1.msra.mxu1 %v271_v42  ;;  %v258_v61 = vld [vmem:[%s2828_s0 + $0x1c8] sm:$0xff]  ;;  %v257_v63 = vld [vmem:[%s2828_s0 + $0x1c0] sm:$0xff]  ;;  %v256_v0 = vld [vmem:[%s2828_s0 + $0x1b8] sm:$0xff] }
  0x20   : > { %453 = vmatprep.subr.mxu0 %v212_v27  ;;  %650 = vmatprep.subr.mxu1 %v270_v44  ;;  %v290_v62 = vld [vmem:[%s1921_s17 + $0x28] sm:$0xff]  ;;  %v255_v2 = vld [vmem:[%s2828_s0 + $0x1b0] sm:$0xff]  ;;  %v293_v5 = vld [vmem:[%s1921_s17 + $0x40] sm:$0xff] }
  0x21   : > { %454 = vmatpush1.msra.mxu0 %v211_v29  ;;  %651 = vmatpush1.msra.mxu1 %v269_v46  ;;  %v254_v3 = vld [vmem:[%s2828_s0 + $0x1a8] sm:$0xff]  ;;  %v253_v6 = vld [vmem:[%s2828_s0 + $0x1a0] sm:$0xff]  ;;  %v252_v7 = vld [vmem:[%s2828_s0 + $0x198] sm:$0xff] }
  0x22   : > { %455 = vmatprep.subr.mxu0 %v210_v31  ;;  %652 = vmatprep.subr.mxu1 %v268_v48  ;;  %v251_v8 = vld [vmem:[%s2828_s0 + $0x190] sm:$0xff]  ;;  %v250_v9 = vld [vmem:[%s2828_s0 + $0x188] sm:$0xff]  ;;  %v296_v10 = vld [vmem:[%s1921_s17 + $0x58] sm:$0xff] }
  0x23   : > { %456 = vmatpush1.msra.mxu0 %v209_v33  ;;  %653 = vmatpush1.msra.mxu1 %v267_v50  ;;  %v249_v11 = vld [vmem:[%s2828_s0 + $0x180] sm:$0xff]  ;;  %v248_v12 = vld [vmem:[%s2828_s0 + $0x178] sm:$0xff]  ;;  %v247_v13 = vld [vmem:[%s2828_s0 + $0x170] sm:$0xff] }
  0x24   : > { %457 = vmatprep.subr.mxu0 %v208_v35  ;;  %654 = vmatprep.subr.mxu1 %v266_v52  ;;  %v246_v14 = vld [vmem:[%s2828_s0 + $0x168] sm:$0xff]  ;;  %v299_v15 = vld [vmem:[%s1921_s17 + $0x70] sm:$0xff]  ;;  %v245_v16 = vld [vmem:[%s2828_s0 + $0x160] sm:$0xff] }
  0x25   : > { %458 = vmatpush1.msra.mxu0 %v207_v37  ;;  %655 = vmatpush1.msra.mxu1 %v265_v54  ;;  %v349_v17 = vld [vmem:[%s1997_s8 + $0x8] sm:$0xff]  ;;  %v244_v18 = vld [vmem:[%s2828_s0 + $0x158] sm:$0xff]  ;;  %v348_v19 = vld [vmem:[%s1997_s8] sm:$0xff] }
  0x26   : > { %459 = vmatprep.subr.mxu0 %v206_v39  ;;  %1630 = vmatmul.mubr.msk.f32.vlgmr.msra.gmra.mxu1 %vm369_vm0, %v287_v56  ;;  %v243_v20 = vld [vmem:[%s2828_s0 + $0x150] sm:$0xff]  ;;  %v242_v22 = vld [vmem:[%s2828_s0 + $0x148] sm:$0xff]  ;;  %v241_v24 = vld [vmem:[%s2828_s0 + $0x140] sm:$0xff] }
  0x27   : > { %460 = vmatpush1.msra.mxu0 %v205_v41  ;;  %497 = vmatprep.mubr.f32.mxu0 %v286_v58  ;;  %v350_v21 = vld [vmem:[%s1997_s8 + $0x10] sm:$0xff]  ;;  %v302_v23 = vld [vmem:[%s1921_s17 + $0x88] sm:$0xff]  ;;  %v240_v25 = vld [vmem:[%s2828_s0 + $0x138] sm:$0xff] }
  0x28   : > { %461 = vmatprep.subr.mxu0 %v204_v43  ;;  %694 = vmatprep.mubr.f32.mxu1 %v1725_v4  ;;  %v239_v26 = vld [vmem:[%s2828_s0 + $0x130] sm:$0xff]  ;;  %v238_v27 = vld [vmem:[%s2828_s0 + $0x128] sm:$0xff]  ;;  %v305_v28 = vld [vmem:[%s1921_s17 + $0xa0] sm:$0xff] }
  0x29   : > { %462 = vmatpush1.msra.mxu0 %v203_v45  ;;  %1327 = vperm.xlu1 %1667, %v349_v17   ;;  %v237_v29 = vld [vmem:[%s2828_s0 + $0x120] sm:$0xff]  ;;  %v236_v30 = vld [vmem:[%s2828_s0 + $0x118] sm:$0xff]  ;;  %v235_v31 = vld [vmem:[%s2828_s0 + $0x110] sm:$0xff] }
  0x2a   : > { %463 = vmatprep.subr.mxu0 %v202_v47  ;;  %1631 = vmatmul.mubr.msk.f32.gmra.mxu1 %vm369_vm0, %v290_v62  ;;  %v234_v32 = vld [vmem:[%s2828_s0 + $0x108] sm:$0xff]  ;;  %v308_v33 = vld [vmem:[%s1921_s17 + $0xb8] sm:$0xff]  ;;  %v233_v34 = vld [vmem:[%s2828_s0 + $0x100] sm:$0xff] }
  0x2b   : > { %464 = vmatpush1.msra.mxu0 %v201_v49  ;;  %700 = vmatprep.mubr.f32.mxu1 %v1725_v4  ;;  %v285_v35 = vld [vmem:[%s1921_s17] sm:$0xff]  ;;  %v311_v37 = vld [vmem:[%s1921_s17 + $0xd0] sm:$0xff]  ;;  %v288_v38 = vld [vmem:[%s1921_s17 + $0x18] sm:$0xff] }
  0x2c   : > { %465 = vmatprep.subr.mxu0 %v264_v51  ;;  %1322 = vperm.xlu0 %1666, %v348_v19   ;;  %v289_v36 = vld [vmem:[%s1921_s17 + $0x20] sm:$0xff]  ;;  %v292_v39 = vld [vmem:[%s1921_s17 + $0x38] sm:$0xff]  ;;  %v314_v40 = vld [vmem:[%s1921_s17 + $0xe8] sm:$0xff] }
  0x2d   : > { %466 = vmatpush2.msra.mxu0 %v263_v53  ;;  %1332 = vperm.xlu1 %1667, %v350_v21   ;;  %v291_v41 = vld [vmem:[%s1921_s17 + $0x30] sm:$0xff]  ;;  %v317_v43 = vld [vmem:[%s1921_s17 + $0x100] sm:$0xff]  ;;  %v294_v44 = vld [vmem:[%s1921_s17 + $0x48] sm:$0xff] }
  0x2e   : > { %467 = vmatprep.subr.mxu0 %v262_v55  ;;  %1632 = vmatmul.mubr.msk.f32.gmra.mxu1 %vm369_vm0, %v293_v5  ;;  %v295_v42 = vld [vmem:[%s1921_s17 + $0x50] sm:$0xff]  ;;  %v298_v45 = vld [vmem:[%s1921_s17 + $0x68] sm:$0xff]  ;;  %v320_v46 = vld [vmem:[%s1921_s17 + $0x118] sm:$0xff] }
  0x2f   : > { %468 = vmatpush2.msra.mxu0 %v261_v57  ;;  %706 = vmatprep.mubr.f32.mxu1 %v1725_v4  ;;  %v297_v47 = vld [vmem:[%s1921_s17 + $0x60] sm:$0xff]  ;;  %v323_v49 = vld [vmem:[%s1921_s17 + $0x130] sm:$0xff]  ;;  %v300_v50 = vld [vmem:[%s1921_s17 + $0x78] sm:$0xff] }
  0x30   : > { %469 = vmatprep.subr.mxu0 %v260_v59  ;;  %v301_v48 = vld [vmem:[%s1921_s17 + $0x80] sm:$0xff]  ;;  %v304_v51 = vld [vmem:[%s1921_s17 + $0x98] sm:$0xff]  ;;  %v326_v52 = vld [vmem:[%s1921_s17 + $0x148] sm:$0xff] }
  0x31   : > { %470 = vmatpush2.msra.mxu0 %v259_v60  ;;  %v303_v53 = vld [vmem:[%s1921_s17 + $0x90] sm:$0xff]  ;;  %v329_v55 = vld [vmem:[%s1921_s17 + $0x160] sm:$0xff]  ;;  %v306_v56 = vld [vmem:[%s1921_s17 + $0xa8] sm:$0xff] }
  0x32   : > { %471 = vmatprep.subr.mxu0 %v258_v61  ;;  %1633 = vmatmul.mubr.msk.f32.gmra.mxu1 %vm369_vm0, %v296_v10  ;;  %v307_v54 = vld [vmem:[%s1921_s17 + $0xb0] sm:$0xff]  ;;  %v310_v57 = vld [vmem:[%s1921_s17 + $0xc8] sm:$0xff]  ;;  %v332_v58 = vld [vmem:[%s1921_s17 + $0x178] sm:$0xff] }
  0x33   : > { %472 = vmatpush2.msra.mxu0 %v257_v63  ;;  %712 = vmatprep.mubr.f32.mxu1 %v1725_v4  ;;  %v309_v59 = vld [vmem:[%s1921_s17 + $0xc0] sm:$0xff]  ;;  %v335_v61 = vld [vmem:[%s1921_s17 + $0x190] sm:$0xff]  ;;  %v312_v62 = vld [vmem:[%s1921_s17 + $0xd8] sm:$0xff] }
  0x34   : > { %473 = vmatprep.subr.mxu0 %v256_v0  ;;  %v313_v60 = vld [vmem:[%s1921_s17 + $0xe0] sm:$0xff]  ;;  %v316_v63 = vld [vmem:[%s1921_s17 + $0xf8] sm:$0xff]  ;;  %v338_v0 = vld [vmem:[%s1921_s17 + $0x1a8] sm:$0xff] }
  0x35   : > { %474 = vmatpush2.msra.mxu0 %v255_v2  ;;  %v315_v2 = vld [vmem:[%s1921_s17 + $0xf0] sm:$0xff]  ;;  %v341_v5 = vld [vmem:[%s1921_s17 + $0x1c0] sm:$0xff]  ;;  %v336_v19 = vld [vmem:[%s1921_s17 + $0x198] sm:$0xff] }
  0x36   : > { %475 = vmatprep.subr.mxu0 %v254_v3  ;;  %1634 = vmatmul.mubr.msk.f32.gmra.mxu1 %vm369_vm0, %v299_v15  ;;  %v319_v3 = vld [vmem:[%s1921_s17 + $0x110] sm:$0xff]  ;;  %v325_v10 = vld [vmem:[%s1921_s17 + $0x140] sm:$0xff] }
  0x37   : > { %476 = vmatpush2.msra.mxu0 %v253_v6  ;;  %718 = vmatprep.mubr.f32.mxu1 %v1725_v4  ;;  %v318_v6 = vld [vmem:[%s1921_s17 + $0x108] sm:$0xff]  ;;  %v331_v15 = vld [vmem:[%s1921_s17 + $0x170] sm:$0xff]  ;;  %v333_v17 = vld [vmem:[%s1921_s17 + $0x180] sm:$0xff] }
  0x38   : > { %477 = vmatprep.subr.mxu0 %v252_v7  ;;  %v322_v7 = vld [vmem:[%s1921_s17 + $0x128] sm:$0xff]  ;;  %v339_v21 = vld [vmem:[%s1921_s17 + $0x1b0] sm:$0xff] }
  0x39   : > { %478 = vmatpush2.msra.mxu0 %v251_v8  ;;  %v344_v8 = vld [vmem:[%s1921_s17 + $0x1d8] sm:$0xff] }
  0x3a   : > { %479 = vmatprep.subr.mxu0 %v250_v9  ;;  %1635 = vmatmul.mubr.msk.f32.gmra.mxu1 %vm369_vm0, %v302_v23  ;;  %v321_v9 = vld [vmem:[%s1921_s17 + $0x120] sm:$0xff]  ;;  %v342_v23 = vld [vmem:[%s1921_s17 + $0x1c8] sm:$0xff] }
  0x3b   : > { %480 = vmatpush2.msra.mxu0 %v249_v11  ;;  %724 = vmatprep.mubr.f32.mxu1 %v1725_v4  ;;  %v347_v11 = vld [vmem:[%s1921_s17 + $0x1f0] sm:$0xff] }
  0x3c   : > { %481 = vmatprep.subr.mxu0 %v248_v12  ;;  %v324_v12 = vld [vmem:[%s1921_s17 + $0x138] sm:$0xff] }
  0x3d   : > { %482 = vmatpush2.msra.mxu0 %v247_v13  ;;  %v328_v13 = vld [vmem:[%s1921_s17 + $0x158] sm:$0xff] }
  0x3e   : > { %483 = vmatprep.subr.mxu0 %v246_v14  ;;  %1636 = vmatmul.mubr.msk.f32.gmra.mxu1 %vm369_vm0, %v305_v28  ;;  %v327_v14 = vld [vmem:[%s1921_s17 + $0x150] sm:$0xff] }
  0x3f   : > { %484 = vmatpush2.msra.mxu0 %v245_v16  ;;  %730 = vmatprep.mubr.f32.mxu1 %v1725_v4  ;;  %v334_v16 = vld [vmem:[%s1921_s17 + $0x188] sm:$0xff] }
  0x40   : > { %485 = vmatprep.subr.mxu0 %v244_v18  ;;  %v337_v18 = vld [vmem:[%s1921_s17 + $0x1a0] sm:$0xff] }
  0x41   : > { %486 = vmatpush2.msra.mxu0 %v243_v20  ;;  %v340_v20 = vld [vmem:[%s1921_s17 + $0x1b8] sm:$0xff] }
  0x42   : > { %487 = vmatprep.subr.mxu0 %v242_v22  ;;  %1637 = vmatmul.mubr.msk.f32.gmra.mxu1 %vm369_vm0, %v308_v33  ;;  %v343_v22 = vld [vmem:[%s1921_s17 + $0x1d0] sm:$0xff] }
  0x43   : > { %488 = vmatpush2.msra.mxu0 %v241_v24  ;;  %736 = vmatprep.mubr.f32.mxu1 %v1725_v4  ;;  %v346_v24 = vld [vmem:[%s1921_s17 + $0x1e8] sm:$0xff] }
  0x44   : > { %489 = vmatprep.subr.mxu0 %v240_v25  ;;  %v345_v25 = vld [vmem:[%s1921_s17 + $0x1e0] sm:$0xff] }
  0x45   : > { %490 = vmatpush2.msra.mxu0 %v239_v26 }
  0x46   : > { %491 = vmatprep.subr.mxu0 %v238_v27  ;;  %1638 = vmatmul.mubr.msk.f32.gmra.mxu1 %vm369_vm0, %v311_v37 }
  0x47   : > { %492 = vmatpush2.msra.mxu0 %v237_v29  ;;  %742 = vmatprep.mubr.f32.mxu1 %v1725_v4 }
  0x48   : > { %493 = vmatprep.subr.mxu0 %v236_v30 }
  0x49   : > { %494 = vmatpush2.msra.mxu0 %v235_v31 }
  0x4a   : > { %495 = vmatprep.subr.mxu0 %v234_v32  ;;  %1639 = vmatmul.mubr.msk.f32.gmra.mxu1 %vm369_vm0, %v314_v40 }
  0x4b   : > { %496 = vmatpush2.msra.mxu0 %v233_v34  ;;  %748 = vmatprep.mubr.f32.mxu1 %v1725_v4 }
  0x4c   : > { %498 = vmatmul.mubr.f32.vlgmr.msra.gmra.mxu0 %v285_v35 }
  0x4d   : > { %503 = vmatprep.mubr.f32.mxu0 %v289_v36 }
  0x4e   : > { %1640 = vmatmul.mubr.msk.f32.gmra.mxu1 %vm369_vm0, %v317_v43 }
  0x4f   : > { %754 = vmatprep.mubr.f32.mxu1 %v1725_v4 }
  0x50   : > { %504 = vmatmul.mubr.f32.gmra.mxu0 %v288_v38 }
  0x51   : > { %509 = vmatprep.mubr.f32.mxu0 %v292_v39 }
  0x52   : > { %1641 = vmatmul.mubr.msk.f32.gmra.mxu1 %vm369_vm0, %v320_v46 }
  0x53   : > { %760 = vmatprep.mubr.f32.mxu1 %v1725_v4 }
  0x54   : > { %510 = vmatmul.mubr.f32.gmra.mxu0 %v291_v41 }
  0x55   : > { %515 = vmatprep.mubr.f32.mxu0 %v295_v42 }
  0x56   : > { %1642 = vmatmul.mubr.msk.f32.gmra.mxu1 %vm369_vm0, %v323_v49 }
  0x57   : > { %766 = vmatprep.mubr.f32.mxu1 %v1725_v4 }
  0x58   : > { %516 = vmatmul.mubr.f32.gmra.mxu0 %v294_v44 }
  0x59   : > { %521 = vmatprep.mubr.f32.mxu0 %v298_v45 }
  0x5a   : > { %1643 = vmatmul.mubr.msk.f32.gmra.mxu1 %vm369_vm0, %v326_v52 }
  0x5b   : > { %772 = vmatprep.mubr.f32.mxu1 %v1725_v4 }
  0x5c   : > { %522 = vmatmul.mubr.f32.gmra.mxu0 %v297_v47 }
  0x5d   : > { %527 = vmatprep.mubr.f32.mxu0 %v301_v48 }
  0x5e   : > { %1644 = vmatmul.mubr.msk.f32.gmra.mxu1 %vm369_vm0, %v329_v55 }
  0x5f   : > { %778 = vmatprep.mubr.f32.mxu1 %v1725_v4 }
  0x60   : > { %528 = vmatmul.mubr.f32.gmra.mxu0 %v300_v50 }
  0x61   : > { %533 = vmatprep.mubr.f32.mxu0 %v304_v51 }
  0x62   : > { %1645 = vmatmul.mubr.msk.f32.gmra.mxu1 %vm369_vm0, %v332_v58 }
  0x63   : > { %784 = vmatprep.mubr.f32.mxu1 %v1725_v4 }
  0x64   : > { %534 = vmatmul.mubr.f32.gmra.mxu0 %v303_v53 }
  0x65   : > { %539 = vmatprep.mubr.f32.mxu0 %v307_v54 }
  0x66   : > { %1646 = vmatmul.mubr.msk.f32.gmra.mxu1 %vm369_vm0, %v335_v61 }
  0x67   : > { %790 = vmatprep.mubr.f32.mxu1 %v1725_v4 }
  0x68   : > { %540 = vmatmul.mubr.f32.gmra.mxu0 %v306_v56 }
  0x69   : > { %545 = vmatprep.mubr.f32.mxu0 %v310_v57 }
  0x6a   : > { %1647 = vmatmul.mubr.msk.f32.gmra.mxu1 %vm369_vm0, %v338_v0 }
  0x6b   : > { %796 = vmatprep.mubr.f32.mxu1 %v1725_v4 }
  0x6c   : > { %546 = vmatmul.mubr.f32.gmra.mxu0 %v309_v59 }
  0x6d   : > { %551 = vmatprep.mubr.f32.mxu0 %v313_v60 }
  0x6e   : > { %1648 = vmatmul.mubr.msk.f32.gmra.mxu1 %vm369_vm0, %v341_v5 }
  0x6f   : > { %802 = vmatprep.mubr.f32.mxu1 %v1725_v4 }
  0x70   : > { %552 = vmatmul.mubr.f32.gmra.mxu0 %v312_v62 }
  0x71   : > { %557 = vmatprep.mubr.f32.mxu0 %v316_v63 }
  0x72   : > { %1649 = vmatmul.mubr.msk.f32.gmra.mxu1 %vm369_vm0, %v344_v8 }
  0x73   : > { %808 = vmatprep.mubr.f32.mxu1 %v1725_v4  ;;  %v330_v4 = vld [vmem:[%s1921_s17 + $0x168] sm:$0xff]  ;;  %s1653_s17 = sshll.u32 %s2887_s21, 4 }
  0x74   : > { %558 = vmatmul.mubr.f32.gmra.mxu0 %v315_v2  ;;  %s2682_s22 = scalar_lea.vmem %s2831_s3, %s1653_s17 }
  0x75   : > { %563 = vmatprep.mubr.f32.mxu0 %v319_v3 }
  0x76   : > { %1650 = vmatmul.mubr.msk.f32.gmra.mxu1 %vm369_vm0, %v347_v11 }
  0x78   : > { %564 = vmatmul.mubr.f32.gmra.mxu0 %v318_v6 }
  0x79   : > { %569 = vmatprep.mubr.f32.mxu0 %v322_v7 }
  0x7c   : > { %570 = vmatmul.mubr.f32.gmra.mxu0 %v321_v9 }
  0x7d   : > { %575 = vmatprep.mubr.f32.mxu0 %v325_v10 }
  0x80   : > { %576 = vmatmul.mubr.f32.gmra.mxu0 %v324_v12 }
  0x81   : > { %581 = vmatprep.mubr.f32.mxu0 %v328_v13 }
  0x84   : > { %582 = vmatmul.mubr.f32.gmra.mxu0 %v327_v14 }
  0x85   : > { %587 = vmatprep.mubr.f32.mxu0 %v331_v15 }
  0x88   : > { %588 = vmatmul.mubr.f32.gmra.mxu0 %v330_v4 }
  0x89   : > { %593 = vmatprep.mubr.f32.mxu0 %v334_v16 }
  0x8c   : > { %594 = vmatmul.mubr.f32.gmra.mxu0 %v333_v17 }
  0x8d   : > { %599 = vmatprep.mubr.f32.mxu0 %v337_v18 }
  0x90   : > { %600 = vmatmul.mubr.f32.gmra.mxu0 %v336_v19 }
  0x91   : > { %605 = vmatprep.mubr.f32.mxu0 %v340_v20 }
  0x94   : > { %606 = vmatmul.mubr.f32.gmra.mxu0 %v339_v21 }
  0x95   : > { %611 = vmatprep.mubr.f32.mxu0 %v343_v22 }
  0x98   : > { %612 = vmatmul.mubr.f32.gmra.mxu0 %v342_v23 }
  0x99   : > { %617 = vmatprep.mubr.f32.mxu0 %v346_v24 }
  0x9c   : > { %618 = vmatmul.mubr.f32.gmra.mxu0 %v345_v25 }
  0xe6   : > { %v690_v26 = vpop.f32.mrf.mxu1 }
  0xe8   : > { %v692_v27 = vpop.f32.mrf.mxu1 }
  0xea   : > { %v696_v28 = vpop.f32.mrf.mxu1 }
  0xec   : > { %v698_v29 = vpop.f32.mrf.mxu1 }
  0xee   : > { %v702_v30 = vpop.f32.mrf.mxu1 }
  0xf0   : > { %v704_v31 = vpop.f32.mrf.mxu1 }
  0xf2   : > { %v708_v32 = vpop.f32.mrf.mxu1 }
  0xf4   : > { %v710_v33 = vpop.f32.mrf.mxu1 }
  0xf6   : > { %v714_v34 = vpop.f32.mrf.mxu1 }
  0xf8   : > { %v716_v35 = vpop.f32.mrf.mxu1 }
  0xfa   : > { %v720_v36 = vpop.f32.mrf.mxu1 }
  0xfc   : > { %v722_v37 = vpop.f32.mrf.mxu1 }
  0xfe   : > { %v726_v38 = vpop.f32.mrf.mxu1 }
 0x100   : > { %v728_v39 = vpop.f32.mrf.mxu1 }
 0x102   : > { %v2140_v40 = vpop.f32.mrf.mxu1 }
 0x104   : > { %v2142_v42 = vpop.f32.mrf.mxu1 }
 0x106   : > { %v2144_v44 = vpop.f32.mrf.mxu1 }
 0x108   : > { %v2150_v48 = vpop.f32.mrf.mxu1 }
 0x10a   : > { %v2155_v52 = vpop.f32.mrf.mxu1 }
 0x10c   : > { %v499_v41 = vpop.f32.mrf.mxu0  ;;  %v2161_v56 = vpop.f32.mrf.mxu1 }
 0x10d   : > { %v2148_v46 = vadd.f32 %v690_v26, %v499_v41 }
 0x10e   : > { %v501_v43 = vpop.f32.mrf.mxu0  ;;  %v2166_v60 = vpop.f32.mrf.mxu1 }
 0x10f   : > { %v2146_v45 = vadd.f32 %v692_v27, %v501_v43 }
 0x110   : > { %v505_v47 = vpop.f32.mrf.mxu0  ;;  %v2172_v0 = vpop.f32.mrf.mxu1 }
 0x111   : > { %v816_v49 = vsel %vm815_vm1, %v2146_v45, 0.0  ;;  %v2159_v54 = vadd.f32 %v696_v28, %v505_v47 }
 0x112   : > { %v507_v50 = vpop.f32.mrf.mxu0  ;;  %v817_v51 = vadd.f32 %v816_v49, %v2148_v46  ;;  %v2177_v6 = vpop.f32.mrf.mxu1 }
 0x113   : > { %v2157_v53 = vadd.f32 %v698_v29, %v507_v50 }
 0x114   : > { %818 = vadd.xlane.f32.xlu0 %v817_v51  ;;  %v511_v55 = vpop.f32.mrf.mxu0  ;;  %v758_v10 = vpop.f32.mrf.mxu1 }
 0x115   : > { %v820_v57 = vsel %vm815_vm1, %v2157_v53, 0.0  ;;  %v2170_v62 = vadd.f32 %v702_v30, %v511_v55 }
 0x116   : > { %v513_v58 = vpop.f32.mrf.mxu0  ;;  %v821_v59 = vadd.f32 %v820_v57, %v2159_v54  ;;  %v2186_v14 = vpop.f32.mrf.mxu1 }
 0x117   : > { %v2168_v61 = vadd.f32 %v704_v31, %v513_v58 }
 0x118   : > { %822 = vadd.xlane.f32.xlu0 %v821_v59  ;;  %v517_v63 = vpop.f32.mrf.mxu0  ;;  %v764_v17 = vpop.f32.mrf.mxu1 }
 0x119   : > { %v824_v2 = vsel %vm815_vm1, %v2168_v61, 0.0  ;;  %v2181_v8 = vadd.f32 %v708_v32, %v517_v63 }
 0x11a   : > { %v519_v3 = vpop.f32.mrf.mxu0  ;;  %v825_v5 = vadd.f32 %v824_v2, %v2170_v62  ;;  %v2195_v21 = vpop.f32.mrf.mxu1 }
 0x11b   : > { %v2179_v7 = vadd.f32 %v710_v33, %v519_v3 }
 0x11c   : > { %826 = vadd.xlane.f32.xlu1 %v825_v5  ;;  %v523_v9 = vpop.f32.mrf.mxu0  ;;  %v770_v28 = vpop.f32.mrf.mxu1 }
 0x11d   : > { %v828_v11 = vsel %vm815_vm1, %v2179_v7, 0.0  ;;  %v2190_v4 = vadd.f32 %v714_v34, %v523_v9 }
 0x11e   : > { %v525_v12 = vpop.f32.mrf.mxu0  ;;  %v829_v13 = vadd.f32 %v828_v11, %v2181_v8 }
 0x11f   : > { %v2188_v15 = vadd.f32 %v716_v35, %v525_v12  ;;  %v774_v35 = vpop.f32.mrf.mxu1 }
 0x120   : > { %830 = vadd.xlane.f32.xlu1 %v829_v13  ;;  %v529_v16 = vpop.f32.mrf.mxu0 }
 0x121   : > { %v832_v18 = vsel %vm815_vm1, %v2188_v15, 0.0  ;;  %v2199_v23 = vadd.f32 %v720_v36, %v529_v16  ;;  %v776_v47 = vpop.f32.mrf.mxu1 }
 0x122   : > { %v531_v19 = vpop.f32.mrf.mxu0  ;;  %v833_v20 = vadd.f32 %v832_v18, %v2190_v4 }
 0x123   : > { %v2197_v22 = vadd.f32 %v722_v37, %v531_v19  ;;  %v780_v57 = vpop.f32.mrf.mxu1 }
 0x124   : > { %834 = vadd.xlane.f32.xlu0 %v833_v20  ;;  %v535_v24 = vpop.f32.mrf.mxu0 }
 0x125   : > { %v836_v25 = vsel %vm815_vm1, %v2197_v22, 0.0  ;;  %v2206_v30 = vadd.f32 %v726_v38, %v535_v24  ;;  %v782_v3 = vpop.f32.mrf.mxu1 }
 0x126   : > { %v537_v26 = vpop.f32.mrf.mxu0  ;;  %v837_v27 = vadd.f32 %v836_v25, %v2199_v23 }
 0x127   : > { %v2204_v29 = vadd.f32 %v728_v39, %v537_v26  ;;  %v786_v13 = vpop.f32.mrf.mxu1 }
 0x128   : > { %838 = vadd.xlane.f32.xlu1 %v837_v27  ;;  %v541_v31 = vpop.f32.mrf.mxu0 }
 0x129   : > { %v840_v32 = vsel %vm815_vm1, %v2204_v29, 0.0  ;;  %v2215_v37 = vadd.f32 %v2140_v40, %v541_v31  ;;  %v788_v24 = vpop.f32.mrf.mxu1 }
 0x12a   : > { %v543_v33 = vpop.f32.mrf.mxu0  ;;  %v841_v34 = vadd.f32 %v840_v32, %v2206_v30 }
 0x12b   : > { %v2212_v36 = vadd.f32 %v2142_v42, %v543_v33  ;;  %v792_v32 = vpop.f32.mrf.mxu1 }
 0x12c   : > { %842 = vadd.xlane.f32.xlu0 %v841_v34  ;;  %v547_v39 = vpop.f32.mrf.mxu0 }
 0x12d   : > { %v844_v38 = vsel %vm815_vm1, %v2212_v36, 0.0  ;;  %v2224_v50 = vadd.f32 %v2144_v44, %v547_v39 }
 0x12e   : > { %v549_v41 = vpop.f32.mrf.mxu0  ;;  %v845_v43 = vadd.f32 %v844_v38, %v2215_v37 }
 0x12f   : > { %v2221_v49 = vadd.f32 %v2150_v48, %v549_v41  ;;  %v794_v41 = vpop.f32.mrf.mxu1 }
 0x130   : > { %846 = vadd.xlane.f32.xlu1 %v845_v43  ;;  %v553_v42 = vpop.f32.mrf.mxu0 }
 0x131   : > { %v848_v40 = vsel %vm815_vm1, %v2221_v49, 0.0  ;;  %v2233_v59 = vadd.f32 %v2155_v52, %v553_v42 }
 0x132   : > { %v555_v51 = vpop.f32.mrf.mxu0  ;;  %v849_v55 = vadd.f32 %v848_v40, %v2224_v50 }
 0x133   : > { %v2230_v58 = vadd.f32 %v2161_v56, %v555_v51 }
 0x134   : > { %850 = vadd.xlane.f32.xlu0 %v849_v55  ;;  %v559_v48 = vpop.f32.mrf.mxu0  ;;  %v798_v55 = vpop.f32.mrf.mxu1 }
 0x135   : > { %v852_v44 = vsel %vm815_vm1, %v2230_v58, 0.0  ;;  %v2242_v9 = vadd.f32 %v2166_v60, %v559_v48 }
 0x136   : > { %v561_v63 = vpop.f32.mrf.mxu0  ;;  %v853_v2 = vadd.f32 %v852_v44, %v2233_v59 }
 0x137   : > { %v2239_v5 = vadd.f32 %v2172_v0, %v561_v63 }
 0x138   : > { %854 = vadd.xlane.f32.xlu1 %v853_v2  ;;  %v565_v56 = vpop.f32.mrf.mxu0 }
 0x139   : > { %v856_v52 = vsel %vm815_vm1, %v2239_v5, 0.0  ;;  %v2250_v18 = vadd.f32 %v2177_v6, %v565_v56  ;;  %v800_v56 = vpop.f32.mrf.mxu1 }
 0x13a   : > { %v567_v11 = vpop.f32.mrf.mxu0  ;;  %v857_v12 = vadd.f32 %v856_v52, %v2242_v9 }
 0x13b   : > { %v2247_v16 = vadd.f32 %v758_v10, %v567_v11 }
 0x13c   : > { %858 = vadd.xlane.f32.xlu0 %v857_v12  ;;  %v571_v0 = vpop.f32.mrf.mxu0 }
 0x13d   : > { %v860_v60 = vsel %vm815_vm1, %v2247_v16, 0.0  ;;  %v2258_v26 = vadd.f32 %v2186_v14, %v571_v0  ;;  %v804_v0 = vpop.f32.mrf.mxu1 }
 0x13e   : > { %v573_v19 = vpop.f32.mrf.mxu0  ;;  %v861_v20 = vadd.f32 %v860_v60, %v2250_v18 }
 0x13f   : > { %v2255_v25 = vadd.f32 %v764_v17, %v573_v19 }
 0x140   : > { %862 = vadd.xlane.f32.xlu1 %v861_v20  ;;  %v577_v10 = vpop.f32.mrf.mxu0 }
 0x141   : > { %v864_v6 = vsel %vm815_vm1, %v2255_v25, 0.0  ;;  %v2266_v34 = vadd.f32 %v2195_v21, %v577_v10 }
 0x142   : > { %v579_v27 = vpop.f32.mrf.mxu0  ;;  %v865_v31 = vadd.f32 %v864_v6, %v2258_v26  ;;  %v806_v6 = vpop.f32.mrf.mxu1 }
 0x143   : > { %v2263_v33 = vadd.f32 %v770_v28, %v579_v27 }
 0x144   : > { %866 = vadd.xlane.f32.xlu0 %v865_v31  ;;  %v583_v17 = vpop.f32.mrf.mxu0 }
 0x145   : > { %v868_v14 = vsel %vm815_vm1, %v2263_v33, 0.0  ;;  %v2273_v42 = vadd.f32 %v774_v35, %v583_v17 }
 0x146   : > { %v585_v39 = vpop.f32.mrf.mxu0  ;;  %v869_v38 = vadd.f32 %v868_v14, %v2266_v34 }
 0x147   : > { %v2271_v43 = vadd.f32 %v776_v47, %v585_v39  ;;  %v810_v39 = vpop.f32.mrf.mxu1 }
 0x148   : > { %870 = vadd.xlane.f32.xlu1 %v869_v38  ;;  %v589_v40 = vpop.f32.mrf.mxu0 }
 0x149   : > { %v872_v28 = vsel %vm815_vm1, %v2271_v43, 0.0  ;;  %v2280_v44 = vadd.f32 %v780_v57, %v589_v40 }
 0x14a   : > { %v591_v21 = vpop.f32.mrf.mxu0  ;;  %v873_v51 = vadd.f32 %v872_v28, %v2273_v42 }
 0x14b   : > { %v2278_v48 = vadd.f32 %v782_v3, %v591_v21 }
 0x14c   : > { %874 = vadd.xlane.f32.xlu0 %v873_v51  ;;  %v595_v63 = vpop.f32.mrf.mxu0  ;;  %v812_v51 = vpop.f32.mrf.mxu1 }
 0x14d   : > { %v876_v47 = vsel %vm815_vm1, %v2278_v48, 0.0  ;;  %v2287_v11 = vadd.f32 %v786_v13, %v595_v63 }
 0x14e   : > { %v597_v35 = vpop.f32.mrf.mxu0  ;;  %v877_v2 = vadd.f32 %v876_v47, %v2280_v44 }
 0x14f   : > { %v2285_v52 = vadd.f32 %v788_v24, %v597_v35 }
 0x150   : > { %878 = vadd.xlane.f32.xlu1 %v877_v2  ;;  %v601_v12 = vpop.f32.mrf.mxu0 }
 0x151   : > { %v880_v57 = vsel %vm815_vm1, %v2285_v52, 0.0  ;;  %v2294_v20 = vadd.f32 %v792_v32, %v601_v12 }
 0x152   : > { %v603_v3 = vpop.f32.mrf.mxu0  ;;  %v881_v60 = vadd.f32 %v880_v57, %v2287_v11  ;;  %v2325_v57 = vld [vmem:[%s1997_s8 + $0x18] sm:$0xff] }
 0x153   : > { %v2292_v19 = vadd.f32 %v794_v41, %v603_v3  ;;  %v2328_v3 = vpop.permute.xlu0 %1322 }
 0x154   : > { %882 = vadd.xlane.f32.xlu0 %v881_v60  ;;  %v607_v10 = vpop.f32.mrf.mxu0  ;;  %v2330_v60 = vpop.permute.xlu1 %1327 }
 0x155   : > { %v884_v13 = vsel %vm815_vm1, %v2292_v19, 0.0  ;;  %v2301_v17 = vadd.f32 %v798_v55, %v607_v10 }
 0x156   : > { %v609_v24 = vpop.f32.mrf.mxu0  ;;  %v885_v27 = vadd.f32 %v884_v13, %v2294_v20 }
 0x157   : > { %v2299_v31 = vadd.f32 %v800_v56, %v609_v24 }
 0x158   : > { %886 = vadd.xlane.f32.xlu1 %v885_v27  ;;  %v613_v14 = vpop.f32.mrf.mxu0  ;;  %v2338_v27 = vpop.permute.xlu1 %1332 }
 0x159   : > { %v888_v32 = vsel %vm815_vm1, %v2299_v31, 0.0  ;;  %v2305_v38 = vadd.f32 %v804_v0, %v613_v14  ;;  %v2321_v0 = vld [vmem:[%s1997_s8 + $0x20] sm:$0xff] }
 0x15a   : > { %v615_v41 = vpop.f32.mrf.mxu0  ;;  %v889_v40 = vadd.f32 %v888_v32, %v2301_v17 }
 0x15b   : > { %v2308_v28 = vadd.f32 %v806_v6, %v615_v41 }
 0x15c   : > { %890 = vadd.xlane.f32.xlu0 %v889_v40  ;;  %v619_v21 = vpop.f32.mrf.mxu0 }
 0x15d   : > { %v892_v55 = vsel %vm815_vm1, %v2308_v28, 0.0  ;;  %v2312_v63 = vadd.f32 %v810_v39, %v619_v21 }
 0x15e   : > { %v621_v47 = vpop.f32.mrf.mxu0  ;;  %v893_v35 = vadd.f32 %v892_v55, %v2305_v38 }
 0x15f   : > { %v2315_v2 = vadd.f32 %v812_v51, %v621_v47 }
 0x160   : > { %894 = vadd.xlane.f32.xlu1 %v893_v35 }
 0x161   : > { %v896_v56 = vsel %vm815_vm1, %v2315_v2, 0.0 }
 0x162   : > { %v897_v12 = vadd.f32 %v896_v56, %v2312_v63 }
 0x164   : > { %898 = vadd.xlane.f32.xlu0 %v897_v12 }
 0x171   : > { %1342 = vperm.xlu1 %1667, %v2321_v0  }
 0x17a   : > { %1337 = vperm.xlu0 %1666, %v2325_v57  }
 0x19d   : > { %v819_v10 = vpop.xlane.xlu0 %818 }
 0x19e   : > { %v900_v6 = vmul.f32 0.0051020407, %v819_v10 }
 0x1a0   : > { %v2333_v13 = vsub.f32 %v2148_v46, %v900_v6  ;;  %v2336_v24 = vsub.f32 %v2146_v45, %v900_v6 }
 0x1a1   : > { %v823_v14 = vpop.xlane.xlu0 %822 }
 0x1a2   : > { %v901_v39 = vmul.f32 0.0051020407, %v823_v14  ;;  %v963_v32 = vmul.f32 %v2333_v13, %v2333_v13  ;;  %v964_v41 = vmul.f32 %v2336_v24, %v2336_v24 }
 0x1a4   : > { %v2345_v40 = vsub.f32 %v2159_v54, %v901_v39  ;;  %v2348_v21 = vsub.f32 %v2157_v53, %v901_v39  ;;  %v1005_v46 = vsel %vm815_vm1, %v964_v41, 0.0 }
 0x1a5   : > { %v827_v45 = vpop.xlane.xlu1 %826  ;;  %v1006_v51 = vadd.f32 %v1005_v46, %v963_v32 }
 0x1a6   : > { %v902_v55 = vmul.f32 0.0051020407, %v827_v45  ;;  %v965_v47 = vmul.f32 %v2345_v40, %v2345_v40  ;;  %v966_v35 = vmul.f32 %v2348_v21, %v2348_v21 }
 0x1a7   : > { %1007 = vadd.xlane.f32.xlu1 %v1006_v51 }
 0x1a8   : > { %v2356_v56 = vsub.f32 %v2170_v62, %v902_v55  ;;  %v2359_v54 = vsub.f32 %v2168_v61, %v902_v55  ;;  %v1009_v53 = vsel %vm815_vm1, %v966_v35, 0.0 }
 0x1a9   : > { %v831_v12 = vpop.xlane.xlu1 %830  ;;  %v1010_v10 = vadd.f32 %v1009_v53, %v965_v47 }
 0x1aa   : > { %v903_v6 = vmul.f32 0.0051020407, %v831_v12  ;;  %v967_v14 = vmul.f32 %v2356_v56, %v2356_v56  ;;  %v968_v39 = vmul.f32 %v2359_v54, %v2359_v54 }
 0x1ab   : > { %1011 = vadd.xlane.f32.xlu0 %v1010_v10 }
 0x1ac   : > { %v2367_v32 = vsub.f32 %v2181_v8, %v903_v6  ;;  %v2370_v62 = vsub.f32 %v2179_v7, %v903_v6  ;;  %v1013_v61 = vsel %vm815_vm1, %v968_v39, 0.0 }
 0x1ad   : > { %v835_v41 = vpop.xlane.xlu0 %834  ;;  %v1014_v46 = vadd.f32 %v1013_v61, %v967_v14 }
 0x1ae   : > { %v904_v45 = vmul.f32 0.0051020407, %v835_v41  ;;  %v969_v51 = vmul.f32 %v2367_v32, %v2367_v32  ;;  %v970_v55 = vmul.f32 %v2370_v62, %v2370_v62 }
 0x1af   : > { %1015 = vadd.xlane.f32.xlu1 %v1014_v46 }
 0x1b0   : > { %v2378_v47 = vsub.f32 %v2190_v4, %v904_v45  ;;  %v2381_v8 = vsub.f32 %v2188_v15, %v904_v45  ;;  %v1017_v7 = vsel %vm815_vm1, %v970_v55, 0.0 }
 0x1b1   : > { %v839_v35 = vpop.xlane.xlu1 %838  ;;  %v1018_v53 = vadd.f32 %v1017_v7, %v969_v51 }
 0x1b2   : > { %v905_v12 = vmul.f32 0.0051020407, %v839_v35  ;;  %v971_v10 = vmul.f32 %v2378_v47, %v2378_v47  ;;  %v972_v6 = vmul.f32 %v2381_v8, %v2381_v8 }
 0x1b3   : > { %1019 = vadd.xlane.f32.xlu0 %v1018_v53 }
 0x1b4   : > { %v2389_v14 = vsub.f32 %v2199_v23, %v905_v12  ;;  %v2392_v4 = vsub.f32 %v2197_v22, %v905_v12  ;;  %v1021_v15 = vsel %vm815_vm1, %v972_v6, 0.0 }
 0x1b5   : > { %v843_v39 = vpop.xlane.xlu0 %842  ;;  %v1022_v61 = vadd.f32 %v1021_v15, %v971_v10 }
 0x1b6   : > { %v906_v41 = vmul.f32 0.0051020407, %v843_v39  ;;  %v973_v46 = vmul.f32 %v2389_v14, %v2389_v14  ;;  %v974_v45 = vmul.f32 %v2392_v4, %v2392_v4 }
 0x1b7   : > { %1023 = vadd.xlane.f32.xlu1 %v1022_v61 }
 0x1b8   : > { %v2400_v51 = vsub.f32 %v2206_v30, %v906_v41  ;;  %v2403_v23 = vsub.f32 %v2204_v29, %v906_v41  ;;  %v1025_v22 = vsel %vm815_vm1, %v974_v45, 0.0 }
 0x1b9   : > { %v847_v55 = vpop.xlane.xlu1 %846  ;;  %v1026_v7 = vadd.f32 %v1025_v22, %v973_v46 }
 0x1ba   : > { %v907_v35 = vmul.f32 0.0051020407, %v847_v55  ;;  %v975_v53 = vmul.f32 %v2400_v51, %v2400_v51  ;;  %v976_v12 = vmul.f32 %v2403_v23, %v2403_v23 }
 0x1bb   : > { %1027 = vadd.xlane.f32.xlu0 %v1026_v7 }
 0x1bc   : > { %v2411_v10 = vsub.f32 %v2215_v37, %v907_v35  ;;  %v2414_v30 = vsub.f32 %v2212_v36, %v907_v35  ;;  %v1029_v29 = vsel %vm815_vm1, %v976_v12, 0.0 }
 0x1bd   : > { %v851_v6 = vpop.xlane.xlu0 %850  ;;  %v1030_v15 = vadd.f32 %v1029_v29, %v975_v53 }
 0x1be   : > { %v908_v39 = vmul.f32 0.0051020407, %v851_v6  ;;  %v977_v61 = vmul.f32 %v2411_v10, %v2411_v10  ;;  %v978_v41 = vmul.f32 %v2414_v30, %v2414_v30 }
 0x1bf   : > { %1031 = vadd.xlane.f32.xlu1 %v1030_v15 }
 0x1c0   : > { %v2422_v46 = vsub.f32 %v2224_v50, %v908_v39  ;;  %v2425_v37 = vsub.f32 %v2221_v49, %v908_v39  ;;  %v1033_v36 = vsel %vm815_vm1, %v978_v41, 0.0 }
 0x1c1   : > { %v855_v45 = vpop.xlane.xlu1 %854  ;;  %v1034_v22 = vadd.f32 %v1033_v36, %v977_v61 }
 0x1c2   : > { %v909_v55 = vmul.f32 0.0051020407, %v855_v45  ;;  %v979_v7 = vmul.f32 %v2422_v46, %v2422_v46  ;;  %v980_v35 = vmul.f32 %v2425_v37, %v2425_v37 }
 0x1c3   : > { %1035 = vadd.xlane.f32.xlu0 %v1034_v22 }
 0x1c4   : > { %v2433_v53 = vsub.f32 %v2233_v59, %v909_v55  ;;  %v2436_v50 = vsub.f32 %v2230_v58, %v909_v55  ;;  %v1037_v49 = vsel %vm815_vm1, %v980_v35, 0.0 }
 0x1c5   : > { %v859_v12 = vpop.xlane.xlu0 %858  ;;  %v1038_v29 = vadd.f32 %v1037_v49, %v979_v7 }
 0x1c6   : > { %v910_v6 = vmul.f32 0.0051020407, %v859_v12  ;;  %v981_v15 = vmul.f32 %v2433_v53, %v2433_v53  ;;  %v982_v39 = vmul.f32 %v2436_v50, %v2436_v50 }
 0x1c7   : > { %1039 = vadd.xlane.f32.xlu1 %v1038_v29 }
 0x1c8   : > { %v2444_v61 = vsub.f32 %v2242_v9, %v910_v6  ;;  %v2447_v59 = vsub.f32 %v2239_v5, %v910_v6  ;;  %v1041_v58 = vsel %vm815_vm1, %v982_v39, 0.0 }
 0x1c9   : > { %v863_v41 = vpop.xlane.xlu1 %862  ;;  %v1042_v36 = vadd.f32 %v1041_v58, %v981_v15 }
 0x1ca   : > { %v911_v45 = vmul.f32 0.0051020407, %v863_v41  ;;  %v983_v22 = vmul.f32 %v2444_v61, %v2444_v61  ;;  %v984_v55 = vmul.f32 %v2447_v59, %v2447_v59 }
 0x1cb   : > { %1043 = vadd.xlane.f32.xlu0 %v1042_v36 }
 0x1cc   : > { %v2455_v7 = vsub.f32 %v2250_v18, %v911_v45  ;;  %v2458_v9 = vsub.f32 %v2247_v16, %v911_v45  ;;  %v1045_v5 = vsel %vm815_vm1, %v984_v55, 0.0 }
 0x1cd   : > { %v867_v35 = vpop.xlane.xlu0 %866  ;;  %v1046_v49 = vadd.f32 %v1045_v5, %v983_v22 }
 0x1ce   : > { %v912_v12 = vmul.f32 0.0051020407, %v867_v35  ;;  %v985_v29 = vmul.f32 %v2455_v7, %v2455_v7  ;;  %v986_v6 = vmul.f32 %v2458_v9, %v2458_v9 }
 0x1cf   : > { %1047 = vadd.xlane.f32.xlu1 %v1046_v49 }
 0x1d0   : > { %v2466_v15 = vsub.f32 %v2258_v26, %v912_v12  ;;  %v2469_v18 = vsub.f32 %v2255_v25, %v912_v12  ;;  %v1049_v16 = vsel %vm815_vm1, %v986_v6, 0.0 }
 0x1d1   : > { %v871_v39 = vpop.xlane.xlu1 %870  ;;  %v1050_v58 = vadd.f32 %v1049_v16, %v985_v29 }
 0x1d2   : > { %2851 = vst [vmem:[#allocation2_spill] sm:$0xff] %v2469_v18  ;;  %v913_v41 = vmul.f32 0.0051020407, %v871_v39  ;;  %v987_v36 = vmul.f32 %v2466_v15, %v2466_v15  ;;  %v988_v45 = vmul.f32 %v2469_v18, %v2469_v18 }
 0x1d3   : > { %1051 = vadd.xlane.f32.xlu0 %v1050_v58 }
 0x1d4   : > { %v2477_v22 = vsub.f32 %v2266_v34, %v913_v41  ;;  %v2480_v26 = vsub.f32 %v2263_v33, %v913_v41  ;;  %v1053_v25 = vsel %vm815_vm1, %v988_v45, 0.0 }
 0x1d5   : > { %v875_v55 = vpop.xlane.xlu0 %874  ;;  %v1054_v5 = vadd.f32 %v1053_v25, %v987_v36 }
 0x1d6   : > { %2852 = vst [vmem:[#allocation3_spill] sm:$0xff] %v2477_v22  ;;  %2853 = vst [vmem:[#allocation4_spill] sm:$0xff] %v2480_v26  ;;  %v914_v35 = vmul.f32 0.0051020407, %v875_v55  ;;  %v989_v49 = vmul.f32 %v2477_v22, %v2477_v22  ;;  %v990_v12 = vmul.f32 %v2480_v26, %v2480_v26 }
 0x1d7   : > { %1055 = vadd.xlane.f32.xlu1 %v1054_v5 }
 0x1d8   : > { %v2488_v29 = vsub.f32 %v2273_v42, %v914_v35  ;;  %v2491_v34 = vsub.f32 %v2271_v43, %v914_v35  ;;  %v1057_v33 = vsel %vm815_vm1, %v990_v12, 0.0 }
 0x1d9   : > { %v879_v6 = vpop.xlane.xlu1 %878  ;;  %v1058_v16 = vadd.f32 %v1057_v33, %v989_v49 }
 0x1da   : > { %2854 = vst [vmem:[#allocation5_spill] sm:$0xff] %v2488_v29  ;;  %2855 = vst [vmem:[#allocation6_spill] sm:$0xff] %v2491_v34  ;;  %v915_v39 = vmul.f32 0.0051020407, %v879_v6  ;;  %v991_v58 = vmul.f32 %v2488_v29, %v2488_v29  ;;  %v992_v41 = vmul.f32 %v2491_v34, %v2491_v34 }
 0x1db   : > { %1059 = vadd.xlane.f32.xlu0 %v1058_v16 }
 0x1dc   : > { %v2499_v36 = vsub.f32 %v2280_v44, %v915_v39  ;;  %v2502_v42 = vsub.f32 %v2278_v48, %v915_v39  ;;  %v1061_v43 = vsel %vm815_vm1, %v992_v41, 0.0 }
 0x1dd   : > { %v883_v45 = vpop.xlane.xlu0 %882  ;;  %v1062_v25 = vadd.f32 %v1061_v43, %v991_v58 }
 0x1de   : > { %2856 = vst [vmem:[#allocation7_spill] sm:$0xff] %v2499_v36  ;;  %2857 = vst [vmem:[#allocation8_spill] sm:$0xff] %v2502_v42  ;;  %v916_v55 = vmul.f32 0.0051020407, %v883_v45  ;;  %v993_v5 = vmul.f32 %v2499_v36, %v2499_v36  ;;  %v994_v35 = vmul.f32 %v2502_v42, %v2502_v42 }
 0x1df   : > { %1063 = vadd.xlane.f32.xlu1 %v1062_v25 }
 0x1e0   : > { %v2510_v49 = vsub.f32 %v2287_v11, %v916_v55  ;;  %v2513_v44 = vsub.f32 %v2285_v52, %v916_v55  ;;  %v1065_v48 = vsel %vm815_vm1, %v994_v35, 0.0 }
 0x1e1   : > { %v887_v12 = vpop.xlane.xlu1 %886  ;;  %v1066_v33 = vadd.f32 %v1065_v48, %v993_v5 }
 0x1e2   : > { %2858 = vst [vmem:[#allocation9_spill] sm:$0xff] %v2510_v49  ;;  %2859 = vst [vmem:[#allocation10_spill] sm:$0xff] %v2513_v44  ;;  %v917_v6 = vmul.f32 0.0051020407, %v887_v12  ;;  %v995_v16 = vmul.f32 %v2510_v49, %v2510_v49  ;;  %v996_v39 = vmul.f32 %v2513_v44, %v2513_v44 }
 0x1e3   : > { %1067 = vadd.xlane.f32.xlu0 %v1066_v33 }
 0x1e4   : > { %v2521_v58 = vsub.f32 %v2294_v20, %v917_v6  ;;  %v2524_v11 = vsub.f32 %v2292_v19, %v917_v6  ;;  %v1069_v52 = vsel %vm815_vm1, %v996_v39, 0.0 }
 0x1e5   : > { %v891_v41 = vpop.xlane.xlu0 %890  ;;  %v1070_v43 = vadd.f32 %v1069_v52, %v995_v16 }
 0x1e6   : > { %2860 = vst [vmem:[#allocation11_spill] sm:$0xff] %v2521_v58  ;;  %2861 = vst [vmem:[#allocation12_spill] sm:$0xff] %v2524_v11  ;;  %v918_v45 = vmul.f32 0.0051020407, %v891_v41  ;;  %v997_v25 = vmul.f32 %v2521_v58, %v2521_v58  ;;  %v998_v55 = vmul.f32 %v2524_v11, %v2524_v11 }
 0x1e7   : > { %1071 = vadd.xlane.f32.xlu1 %v1070_v43 }
 0x1e8   : > { %v2532_v5 = vsub.f32 %v2301_v17, %v918_v45  ;;  %v2535_v20 = vsub.f32 %v2299_v31, %v918_v45  ;;  %v1073_v19 = vsel %vm815_vm1, %v998_v55, 0.0  ;;  %v2559_v45 = vld [vmem:[%s1997_s8 + $0x40] sm:$0xff]  ;;  %v2566_v55 = vld [vmem:[%s1997_s8 + $0x28] sm:$0xff] }
 0x1e9   : > { %v895_v35 = vpop.xlane.xlu1 %894  ;;  %v1074_v48 = vadd.f32 %v1073_v19, %v997_v25  ;;  %v2563_v25 = vld [vmem:[%s1997_s8 + $0x50] sm:$0xff]  ;;  %v2571_v19 = vld [vmem:[%s1997_s8 + $0x60] sm:$0xff] }
 0x1ea   : > { %2862 = vst [vmem:[#allocation13_spill] sm:$0xff] %v2532_v5  ;;  %2863 = vst [vmem:[#allocation14_spill] sm:$0xff] %v2535_v20  ;;  %v919_v12 = vmul.f32 0.0051020407, %v895_v35  ;;  %v999_v33 = vmul.f32 %v2532_v5, %v2532_v5  ;;  %v1000_v6 = vmul.f32 %v2535_v20, %v2535_v20  ;;  %v2574_v35 = vld [vmem:[%s1997_s8 + $0x38] sm:$0xff] }
 0x1eb   : > { %1075 = vadd.xlane.f32.xlu0 %v1074_v48  ;;  %v2579_v48 = vld [vmem:[%s1997_s8 + $0x70] sm:$0xff] }
 0x1ec   : > { %v2543_v17 = vsub.f32 %v2305_v38, %v919_v12  ;;  %v2546_v31 = vsub.f32 %v2308_v28, %v919_v12  ;;  %v1077_v16 = vsel %vm815_vm1, %v1000_v6, 0.0  ;;  %v2555_v28 = vld [vmem:[%s1997_s8 + $0x30] sm:$0xff]  ;;  %v2582_v12 = vld [vmem:[%s1997_s8 + $0x48] sm:$0xff]  ;;  %v2590_v6 = vld [vmem:[%s1997_s8 + $0x58] sm:$0xff] }
 0x1ed   : > { %v1078_v39 = vadd.f32 %v1077_v16, %v999_v33  ;;  %v2587_v33 = vld [vmem:[%s1997_s8 + $0x80] sm:$0xff]  ;;  %v2595_v16 = vld [vmem:[%s1997_s8 + $0x90] sm:$0xff] }
 0x1ee   : > { %2864 = vst [vmem:[#allocation15_spill] sm:$0xff] %v2543_v17  ;;  %2865 = vst [vmem:[#allocation16_spill] sm:$0xff] %v2546_v31  ;;  %v1001_v52 = vmul.f32 %v2543_v17, %v2543_v17  ;;  %v1002_v41 = vmul.f32 %v2546_v31, %v2546_v31  ;;  %v2610_v31 = vpop.permute.xlu1 %1342 }
 0x1ef   : > { %1079 = vadd.xlane.f32.xlu1 %v1078_v39  ;;  %v2598_v39 = vld [vmem:[%s1997_s8 + $0x68] sm:$0xff] }
 0x1f0   : > { %v1081_v43 = vsel %vm815_vm1, %v1002_v41, 0.0  ;;  %v1727_v41 = vmov 0  }
 0x1f1   : > { %v1082_v38 = vadd.f32 %v1081_v43, %v1001_v52  ;;  %v2603_v52 = vld [vmem:[%s1997_s8 + $0x78] sm:$0xff]  ;;  %v2607_v43 = vld [vmem:[%s1997_s8 + $0x88] sm:$0xff] }
 0x1f3   : > { %1083 = vadd.xlane.f32.xlu0 %v1082_v38  ;;  %v899_v38 = vpop.xlane.xlu0 %898 }
 0x1f4   : > { %v920_v1 = vmul.f32 0.0051020407, %v899_v38 }
 0x1f6   : > { %v2613_v17 = vsub.f32 %v2315_v2, %v920_v1  ;;  %v2618_v58 = vsub.f32 %v2312_v63, %v920_v1 }
 0x1f7   : > { %v2615_v20 = vpop.permute.xlu0 %1337 }
 0x1f8   : > { %2866 = vst [vmem:[#allocation17_spill] sm:$0xff] %v2613_v17  ;;  %2867 = vst [vmem:[#allocation18_spill] sm:$0xff] %v2618_v58  ;;  %v1004_v49 = vmul.f32 %v2613_v17, %v2613_v17  ;;  %v1003_v38 = vmul.f32 %v2618_v58, %v2618_v58 }
 0x1fa   : > { %v1085_v2 = vsel %vm815_vm1, %v1004_v49, 0.0 }
 0x200   : > { %1352 = vperm.xlu1 %1667, %v2555_v28  }
 0x204   : > { %1362 = vperm.xlu1 %1667, %v2559_v45  }
 0x208   : > { %1372 = vperm.xlu1 %1667, %v2563_v25  }
 0x209   : > { %1347 = vperm.xlu0 %1666, %v2566_v55  }
 0x20c   : > { %1382 = vperm.xlu1 %1667, %v2571_v19  }
 0x20d   : > { %1357 = vperm.xlu0 %1666, %v2574_v35  }
 0x210   : > { %1392 = vperm.xlu1 %1667, %v2579_v48  }
 0x211   : > { %1367 = vperm.xlu0 %1666, %v2582_v12  }
 0x214   : > { %1402 = vperm.xlu1 %1667, %v2587_v33  }
 0x215   : > { %1377 = vperm.xlu0 %1666, %v2590_v6  }
 0x218   : > { %1412 = vperm.xlu1 %1667, %v2595_v16  }
 0x219   : > { %1387 = vperm.xlu0 %1666, %v2598_v39  }
 0x21c   : > { %1669 = vset.pattern.permute.xlu1 %v1727_v41 }
 0x21d   : > { %1397 = vperm.xlu0 %1666, %v2603_v52  }
 0x221   : > { %1407 = vperm.xlu0 %1666, %v2607_v43  }
 0x225   : > { %1668 = vset.pattern.permute.xlu0 %v1727_v41 }
 0x230   : > { %v1008_v5 = vpop.xlane.xlu1 %1007 }
 0x231   : > { %v1089_v11 = vmul.f32 0.0051020407, %v1008_v5  ;;  %v1086_v5 = vadd.f32 %v1085_v2, %v1003_v38 }
 0x233   : > { %v1110_v44 = vadd.f32 1e-05, %v1089_v11 }
 0x234   : > { %v1012_v42 = vpop.xlane.xlu0 %1011 }
 0x235   : > { %1672 = vrsqrt.f32 %v1110_v44  ;;  %v1090_v41 = vmul.f32 0.0051020407, %v1012_v42 }
 0x237   : > { %v1111_v36 = vadd.f32 1e-05, %v1090_v41  ;;  %v1714_v41 = vld [vmem:[%s1997_s8] sm:$0xff] }
 0x238   : > { %v1016_v34 = vpop.xlane.xlu1 %1015 }
 0x239   : > { %v1091_v29 = vmul.f32 0.0051020407, %v1016_v34  ;;  %1674 = vrsqrt.f32 %v1111_v36 }
 0x23b   : > { %v1112_v1 = vadd.f32 1e-05, %v1091_v29 }
 0x23c   : > { %1087 = vadd.xlane.f32.xlu1 %v1086_v5  ;;  %v1020_v63 = vpop.xlane.xlu0 %1019  ;;  %v1715_v5 = vld [vmem:[%s1997_s8 + $0x8] sm:$0xff] }
 0x23d   : > { %v1092_v11 = vmul.f32 0.0051020407, %v1020_v63  ;;  %1676 = vrsqrt.f32 %v1112_v1 }
 0x23f   : > { %v1113_v17 = vadd.f32 1e-05, %v1092_v11 }
 0x240   : > { %v1024_v26 = vpop.xlane.xlu1 %1023 }
 0x241   : > { %v1093_v44 = vmul.f32 0.0051020407, %v1024_v26  ;;  %1678 = vrsqrt.f32 %v1113_v17 }
 0x242   : > { %v1673_v42 = vpop.eup %1672 }
 0x243   : > { %v1114_v58 = vadd.f32 1e-05, %v1093_v44  ;;  %v1152_v22 = vmul.f32 %v1714_v41, %v1673_v42  ;;  %v1716_v44 = vld [vmem:[%s1997_s8 + $0x10] sm:$0xff] }
 0x244   : > { %v1028_v49 = vpop.xlane.xlu0 %1027 }
 0x245   : > { %v1094_v18 = vmul.f32 0.0051020407, %v1028_v49  ;;  %1175 = vperm.xlu0 %1668, %v1152_v22   ;;  %1680 = vrsqrt.f32 %v1114_v58 }
 0x246   : > { %v1675_v29 = vpop.eup %1674 }
 0x247   : > { %v1115_v34 = vadd.f32 1e-05, %v1094_v18  ;;  %v1153_v1 = vmul.f32 %v1715_v5, %v1675_v29 }
 0x248   : > { %v1032_v36 = vpop.xlane.xlu1 %1031 }
 0x249   : > { %v1095_v38 = vmul.f32 0.0051020407, %v1032_v36  ;;  %1682 = vrsqrt.f32 %v1115_v34 }
 0x24a   : > { %v1677_v26 = vpop.eup %1676 }
 0x24b   : > { %v1116_v2 = vadd.f32 1e-05, %v1095_v38  ;;  %v1154_v42 = vmul.f32 %v1716_v44, %v1677_v26 }
 0x24c   : > { %v1036_v63 = vpop.xlane.xlu0 %1035 }
 0x24d   : > { %v1096_v11 = vmul.f32 0.0051020407, %v1036_v63  ;;  %1180 = vperm.xlu1 %1669, %v1153_v1   ;;  %1684 = vrsqrt.f32 %v1116_v2 }
 0x24e   : > { %v1679_v41 = vpop.eup %1678 }
 0x24f   : > { %v1117_v17 = vadd.f32 1e-05, %v1096_v11  ;;  %v1155_v58 = vmul.f32 %v1679_v41, %v2325_v57 }
 0x250   : > { %v1040_v22 = vpop.xlane.xlu1 %1039 }
 0x251   : > { %v1097_v49 = vmul.f32 0.0051020407, %v1040_v22  ;;  %1185 = vperm.xlu1 %1669, %v1154_v42   ;;  %1686 = vrsqrt.f32 %v1117_v17 }
 0x252   : > { %v1681_v34 = vpop.eup %1680 }
 0x253   : > { %v1118_v18 = vadd.f32 1e-05, %v1097_v49  ;;  %v1156_v5 = vmul.f32 %v1681_v34, %v2321_v0 }
 0x254   : > { %v1044_v36 = vpop.xlane.xlu0 %1043 }
 0x255   : > { %v1098_v38 = vmul.f32 0.0051020407, %v1044_v36  ;;  %1190 = vperm.xlu1 %1669, %v1155_v58   ;;  %1688 = vrsqrt.f32 %v1118_v18 }
 0x256   : > { %v1683_v2 = vpop.eup %1682 }
 0x257   : > { %v1119_v29 = vadd.f32 1e-05, %v1098_v38  ;;  %v1157_v11 = vmul.f32 %v1683_v2, %v2566_v55 }
 0x258   : > { %v1048_v1 = vpop.xlane.xlu1 %1047 }
 0x259   : > { %1690 = vrsqrt.f32 %v1119_v29  ;;  %v1099_v26 = vmul.f32 0.0051020407, %v1048_v1  ;;  %1195 = vperm.xlu1 %1669, %v1156_v5  }
 0x25a   : > { %v1685_v17 = vpop.eup %1684 }
 0x25b   : > { %v1120_v63 = vadd.f32 1e-05, %v1099_v26  ;;  %v1158_v41 = vmul.f32 %v1685_v17, %v2555_v28 }
 0x25c   : > { %v1052_v44 = vpop.xlane.xlu0 %1051 }
 0x25d   : > { %1692 = vrsqrt.f32 %v1120_v63  ;;  %v1100_v57 = vmul.f32 0.0051020407, %v1052_v44  ;;  %1200 = vperm.xlu1 %1669, %v1157_v11  }
 0x25e   : > { %v1687_v22 = vpop.eup %1686 }
 0x25f   : > { %v1121_v42 = vadd.f32 1e-05, %v1100_v57  ;;  %v1159_v58 = vmul.f32 %v1687_v22, %v2574_v35 }
 0x260   : > { %v1056_v49 = vpop.xlane.xlu1 %1055 }
 0x261   : > { %1694 = vrsqrt.f32 %v1121_v42  ;;  %v1101_v0 = vmul.f32 0.0051020407, %v1056_v49  ;;  %1205 = vperm.xlu1 %1669, %v1158_v41  }
 0x262   : > { %v1689_v34 = vpop.eup %1688 }
 0x263   : > { %v1122_v18 = vadd.f32 1e-05, %v1101_v0  ;;  %v1160_v5 = vmul.f32 %v1689_v34, %v2559_v45 }
 0x264   : > { %v1060_v36 = vpop.xlane.xlu0 %1059 }
 0x265   : > { %1696 = vrsqrt.f32 %v1122_v18  ;;  %v1102_v55 = vmul.f32 0.0051020407, %v1060_v36  ;;  %1210 = vperm.xlu1 %1669, %v1159_v58  }
 0x266   : > { %v1691_v38 = vpop.eup %1690 }
 0x267   : > { %v1123_v29 = vadd.f32 1e-05, %v1102_v55  ;;  %v1161_v2 = vmul.f32 %v1691_v38, %v2582_v12 }
 0x268   : > { %v1064_v28 = vpop.xlane.xlu1 %1063 }
 0x269   : > { %1698 = vrsqrt.f32 %v1123_v29  ;;  %v1103_v1 = vmul.f32 0.0051020407, %v1064_v28  ;;  %1215 = vperm.xlu1 %1669, %v1160_v5   ;;  %1220 = vperm.xlu0 %1668, %v1161_v2  }
 0x26a   : > { %v1693_v26 = vpop.eup %1692 }
 0x26b   : > { %v1124_v63 = vadd.f32 1e-05, %v1103_v1  ;;  %v1162_v35 = vmul.f32 %v1693_v26, %v2563_v25 }
 0x26c   : > { %v1068_v11 = vpop.xlane.xlu0 %1067 }
 0x26d   : > { %1700 = vrsqrt.f32 %v1124_v63  ;;  %v1104_v17 = vmul.f32 0.0051020407, %v1068_v11  ;;  %1225 = vperm.xlu1 %1669, %v1162_v35  }
 0x26e   : > { %v1695_v44 = vpop.eup %1694 }
 0x26f   : > { %v1125_v57 = vadd.f32 1e-05, %v1104_v17  ;;  %v1163_v42 = vmul.f32 %v1695_v44, %v2590_v6  ;;  %v367_v17 = vld [vmem:[%s1997_s8 + $0x98] sm:$0xff] }
 0x270   : > { %v1072_v45 = vpop.xlane.xlu1 %1071 }
 0x271   : > { %1702 = vrsqrt.f32 %v1125_v57  ;;  %v1105_v12 = vmul.f32 0.0051020407, %v1072_v45  ;;  %1230 = vperm.xlu0 %1668, %v1163_v42   ;;  %v2868_v42 = vmov 1  }
 0x272   : > { %v1697_v41 = vpop.eup %1696 }
 0x273   : > { %v1126_v22 = vadd.f32 1e-05, %v1105_v12  ;;  %v1164_v49 = vmul.f32 %v1697_v41, %v2571_v19 }
 0x274   : > { %v1076_v0 = vpop.xlane.xlu0 %1075 }
 0x275   : > { %1704 = vrsqrt.f32 %v1126_v22  ;;  %v1106_v18 = vmul.f32 0.0051020407, %v1076_v0  ;;  %1235 = vperm.xlu1 %1669, %v1164_v49  }
 0x276   : > { %v1699_v25 = vpop.eup %1698 }
 0x277   : > { %v1127_v58 = vadd.f32 1e-05, %v1106_v18  ;;  %v1165_v34 = vmul.f32 %v1699_v25, %v2598_v39 }
 0x278   : > { %v1080_v36 = vpop.xlane.xlu1 %1079 }
 0x279   : > { %1706 = vrsqrt.f32 %v1127_v58  ;;  %v1107_v55 = vmul.f32 0.0051020407, %v1080_v36  ;;  %1240 = vperm.xlu0 %1668, %v1165_v34  }
 0x27a   : > { %v1701_v6 = vpop.eup %1700 }
 0x27b   : > { %v1128_v38 = vadd.f32 1e-05, %v1107_v55  ;;  %v1166_v29 = vmul.f32 %v1701_v6, %v2579_v48 }
 0x27c   : > { %v1084_v5 = vpop.xlane.xlu0 %1083 }
 0x27d   : > { %1708 = vrsqrt.f32 %v1128_v38  ;;  %v1108_v19 = vmul.f32 0.0051020407, %v1084_v5  ;;  %1245 = vperm.xlu1 %1669, %v1166_v29  }
 0x27e   : > { %v1703_v2 = vpop.eup %1702 }
 0x27f   : > { %v1129_v28 = vadd.f32 1e-05, %v1108_v19  ;;  %v1167_v1 = vmul.f32 %v1703_v2, %v2603_v52 }
 0x281   : > { %1710 = vrsqrt.f32 %v1129_v28  ;;  %1250 = vperm.xlu0 %1668, %v1167_v1  }
 0x282   : > { %v1705_v39 = vpop.eup %1704 }
 0x283   : > { %v1168_v26 = vmul.f32 %v1705_v39, %v2587_v33  ;;  %v2648_v33 = vpop.permute.xlu1 %1352 }
 0x284   : > { %v2646_v52 = vpop.permute.xlu0 %1347 }
 0x285   : > { %1255 = vperm.xlu1 %1669, %v1168_v26  }
 0x286   : > { %v1707_v63 = vpop.eup %1706 }
 0x287   : > { %v1169_v35 = vmul.f32 %v1707_v63, %v2607_v43  ;;  %v2652_v43 = vpop.permute.xlu1 %1362 }
 0x288   : > { %v2650_v45 = vpop.permute.xlu0 %1357 }
 0x289   : > { %1260 = vperm.xlu0 %1668, %v1169_v35  }
 0x28a   : > { %v1709_v48 = vpop.eup %1708 }
 0x28b   : > { %v1170_v11 = vmul.f32 %v1709_v48, %v2595_v16  ;;  %v2656_v16 = vpop.permute.xlu1 %1372 }
 0x28c   : > { %v2654_v12 = vpop.permute.xlu0 %1367 }
 0x28d   : > { %1265 = vperm.xlu1 %1669, %v1170_v11  }
 0x28e   : > { %v1711_v44 = vpop.eup %1710 }
 0x28f   : > { %v1171_v57 = vmul.f32 %v1711_v44, %v367_v17  ;;  %v2660_v22 = vpop.permute.xlu1 %1382 }
 0x290   : > { %v2658_v41 = vpop.permute.xlu0 %1377 }
 0x291   : > { %1270 = vperm.xlu0 %1668, %v1171_v57  }
 0x293   : > { %v2664_v0 = vpop.permute.xlu1 %1392 }
 0x294   : > { %v2662_v49 = vpop.permute.xlu0 %1387 }
 0x295   : > { %1670 = vset.pattern.permute.xlu0 %v2868_v42 }
 0x296   : > { %1417 = vperm.xlu0 %1670, %v367_v17  }
 0x297   : > { %v2668_v25 = vpop.permute.xlu1 %1402 }
 0x298   : > { %v2666_v18 = vpop.permute.xlu0 %1397 }
 0x29b   : > { %v2672_v36 = vpop.permute.xlu1 %1412 }
 0x29c   : > { %v2670_v58 = vpop.permute.xlu0 %1407 }
 0x2c0   : > { %v1176_v34 = vpop.permute.xlu0 %1175 }
 0x2c1   : > { %v1278_v55 = vmul.f32 %v1176_v34, %v2333_v13  ;;  %v1279_v6 = vmul.f32 %v1176_v34, %v2336_v24 }
 0x2c3   : > { %v1425_v38 = vadd.f32 %v2328_v3, %v1278_v55  ;;  %v1426_v29 = vadd.f32 %v2328_v3, %v1279_v6 }
 0x2c5   : > { %v1467_v5 = vmax.f32 %v1425_v38, 0.0  ;;  %v1468_v19 = vmax.f32 %v1426_v29, 0.0  ;;  %v1088_v2 = vpop.xlane.xlu1 %1087  ;;  %v368_v38 = vld [vmem:[%s1997_s8 + $0xa0] sm:$0xff] }
 0x2c6   : > { %v1109_v28 = vmul.f32 0.0051020407, %v1088_v2 }
 0x2c7   : > { %1509 = vst [vmem:[%s2682_s22] sm:$0xff] %v1467_v5  ;;  %1510 = vst.msk [vmem:[%s2682_s22 + $0x8] sm:$0xff] %vm815_vm1, %v1468_v19 }
 0x2c8   : > { %v1130_v13 = vadd.f32 1e-05, %v1109_v28 }
 0x2c9   : > { %v1181_v24 = vpop.permute.xlu1 %1180 }
 0x2ca   : > { %1712 = vrsqrt.f32 %v1130_v13  ;;  %v1280_v3 = vmul.f32 %v1181_v24, %v2345_v40  ;;  %v1281_v1 = vmul.f32 %v1181_v24, %v2348_v21 }
 0x2cc   : > { %v1427_v39 = vadd.f32 %v2330_v60, %v1280_v3  ;;  %v1428_v26 = vadd.f32 %v2330_v60, %v1281_v1 }
 0x2cd   : > { %v1186_v63 = vpop.permute.xlu1 %1185 }
 0x2ce   : > { %v1469_v35 = vmax.f32 %v1427_v39, 0.0  ;;  %v1470_v48 = vmax.f32 %v1428_v26, 0.0  ;;  %v1282_v11 = vmul.f32 %v1186_v63, %v2356_v56  ;;  %v1283_v17 = vmul.f32 %v1186_v63, %v2359_v54 }
 0x2d0   : > { %1511 = vst [vmem:[%s2682_s22 + $0x10] sm:$0xff] %v1469_v35  ;;  %1512 = vst.msk [vmem:[%s2682_s22 + $0x18] sm:$0xff] %vm815_vm1, %v1470_v48  ;;  %v1429_v40 = vadd.f32 %v2338_v27, %v1282_v11  ;;  %v1430_v21 = vadd.f32 %v2338_v27, %v1283_v17 }
 0x2d1   : > { %v1191_v44 = vpop.permute.xlu1 %1190 }
 0x2d2   : > { %v1471_v57 = vmax.f32 %v1429_v40, 0.0  ;;  %v1472_v60 = vmax.f32 %v1430_v21, 0.0  ;;  %v1284_v34 = vmul.f32 %v1191_v44, %v2367_v32  ;;  %v1285_v55 = vmul.f32 %v1191_v44, %v2370_v62 }
 0x2d4   : > { %1513 = vst [vmem:[%s2682_s22 + $0x20] sm:$0xff] %v1471_v57  ;;  %1514 = vst.msk [vmem:[%s2682_s22 + $0x28] sm:$0xff] %vm815_vm1, %v1472_v60  ;;  %v1431_v56 = vadd.f32 %v2615_v20, %v1284_v34  ;;  %v1432_v54 = vadd.f32 %v2615_v20, %v1285_v55 }
 0x2d5   : > { %v1196_v6 = vpop.permute.xlu1 %1195 }
 0x2d6   : > { %v1473_v29 = vmax.f32 %v1431_v56, 0.0  ;;  %v1474_v27 = vmax.f32 %v1432_v54, 0.0  ;;  %v1286_v5 = vmul.f32 %v1196_v6, %v2378_v47  ;;  %v1287_v19 = vmul.f32 %v1196_v6, %v2381_v8 }
 0x2d7   : > { %v1713_v32 = vpop.eup %1712 }
 0x2d8   : > { %1515 = vst [vmem:[%s2682_s22 + $0x30] sm:$0xff] %v1473_v29  ;;  %1516 = vst.msk [vmem:[%s2682_s22 + $0x38] sm:$0xff] %vm815_vm1, %v1474_v27  ;;  %v1433_v62 = vadd.f32 %v2610_v31, %v1286_v5  ;;  %v1434_v2 = vadd.f32 %v2610_v31, %v1287_v19  ;;  %v1172_v28 = vmul.f32 %v1713_v32, %v368_v38 }
 0x2d9   : > { %v1201_v20 = vpop.permute.xlu1 %1200 }
 0x2da   : > { %v1475_v13 = vmax.f32 %v1433_v62, 0.0  ;;  %v1476_v24 = vmax.f32 %v1434_v2, 0.0  ;;  %v1288_v3 = vmul.f32 %v1201_v20, %v2389_v14  ;;  %v1289_v47 = vmul.f32 %v1201_v20, %v2392_v4  ;;  %1275 = vperm.xlu1 %1669, %v1172_v28   ;;  %v2869_v20 = vld [vmem:[#allocation2_spill] sm:$0xff] }
 0x2dc   : > { %1517 = vst [vmem:[%s2682_s22 + $0x40] sm:$0xff] %v1475_v13  ;;  %1518 = vst.msk [vmem:[%s2682_s22 + $0x48] sm:$0xff] %vm815_vm1, %v1476_v24  ;;  %v1435_v8 = vadd.f32 %v2646_v52, %v1288_v3  ;;  %v1436_v1 = vadd.f32 %v2646_v52, %v1289_v47  ;;  %v2870_v47 = vld [vmem:[#allocation3_spill] sm:$0xff] }
 0x2dd   : > { %v1206_v39 = vpop.permute.xlu1 %1205 }
 0x2de   : > { %v1477_v31 = vmax.f32 %v1435_v8, 0.0  ;;  %v1478_v26 = vmax.f32 %v1436_v1, 0.0  ;;  %v1290_v63 = vmul.f32 %v1206_v39, %v2400_v51  ;;  %v1291_v35 = vmul.f32 %v1206_v39, %v2403_v23  ;;  %1671 = vset.pattern.permute.xlu1 %v2868_v42  ;;  %v2871_v1 = vld [vmem:[#allocation4_spill] sm:$0xff] }
 0x2df   : > { %1422 = vperm.xlu1 %1671, %v368_v38  }
 0x2e0   : > { %1519 = vst [vmem:[%s2682_s22 + $0x50] sm:$0xff] %v1477_v31  ;;  %1520 = vst.msk [vmem:[%s2682_s22 + $0x58] sm:$0xff] %vm815_vm1, %v1478_v26  ;;  %v1437_v14 = vadd.f32 %v2648_v33, %v1290_v63  ;;  %v1438_v4 = vadd.f32 %v2648_v33, %v1291_v35  ;;  %v2872_v35 = vld [vmem:[#allocation5_spill] sm:$0xff] }
 0x2e1   : > { %v1211_v52 = vpop.permute.xlu1 %1210 }
 0x2e2   : > { %v1479_v48 = vmax.f32 %v1437_v14, 0.0  ;;  %v1480_v11 = vmax.f32 %v1438_v4, 0.0  ;;  %v1292_v17 = vmul.f32 %v1211_v52, %v2411_v10  ;;  %v1293_v51 = vmul.f32 %v1211_v52, %v2414_v30  ;;  %v2873_v4 = vld [vmem:[#allocation6_spill] sm:$0xff] }
 0x2e4   : > { %1521 = vst [vmem:[%s2682_s22 + $0x60] sm:$0xff] %v1479_v48  ;;  %1522 = vst.msk [vmem:[%s2682_s22 + $0x68] sm:$0xff] %vm815_vm1, %v1480_v11  ;;  %v1439_v23 = vadd.f32 %v2650_v45, %v1292_v17  ;;  %v1440_v42 = vadd.f32 %v2650_v45, %v1293_v51  ;;  %v1221_v40 = vpop.permute.xlu0 %1220 }
 0x2e5   : > { %v1296_v21 = vmul.f32 %v1221_v40, %v2433_v53  ;;  %v1297_v33 = vmul.f32 %v1221_v40, %v2436_v50  ;;  %v1216_v44 = vpop.permute.xlu1 %1215  ;;  %v2875_v40 = vld [vmem:[#allocation8_spill] sm:$0xff] }
 0x2e6   : > { %v1481_v57 = vmax.f32 %v1439_v23, 0.0  ;;  %v1482_v60 = vmax.f32 %v1440_v42, 0.0  ;;  %v1294_v10 = vmul.f32 %v1216_v44, %v2422_v46  ;;  %v1295_v30 = vmul.f32 %v1216_v44, %v2425_v37  ;;  %v2874_v23 = vld [vmem:[#allocation7_spill] sm:$0xff] }
 0x2e7   : > { %v1443_v34 = vadd.f32 %v2654_v12, %v1296_v21  ;;  %v1444_v45 = vadd.f32 %v2654_v12, %v1297_v33 }
 0x2e8   : > { %1523 = vst [vmem:[%s2682_s22 + $0x70] sm:$0xff] %v1481_v57  ;;  %1524 = vst.msk [vmem:[%s2682_s22 + $0x78] sm:$0xff] %vm815_vm1, %v1482_v60  ;;  %v1441_v53 = vadd.f32 %v2652_v43, %v1294_v10  ;;  %v1442_v50 = vadd.f32 %v2652_v43, %v1295_v30  ;;  %v2876_v10 = vld [vmem:[#allocation9_spill] sm:$0xff] }
 0x2e9   : > { %v1485_v55 = vmax.f32 %v1443_v34, 0.0  ;;  %v1486_v56 = vmax.f32 %v1444_v45, 0.0  ;;  %v1226_v54 = vpop.permute.xlu1 %1225  ;;  %v2877_v34 = vld [vmem:[#allocation10_spill] sm:$0xff] }
 0x2ea   : > { %v1483_v46 = vmax.f32 %v1441_v53, 0.0  ;;  %v1484_v6 = vmax.f32 %v1442_v50, 0.0  ;;  %v1298_v37 = vmul.f32 %v1226_v54, %v2444_v61  ;;  %v1299_v38 = vmul.f32 %v1226_v54, %v2447_v59  ;;  %v2878_v54 = vld [vmem:[#allocation11_spill] sm:$0xff] }
 0x2eb   : > { %1527 = vst [vmem:[%s2682_s22 + $0x90] sm:$0xff] %v1485_v55  ;;  %1528 = vst.msk [vmem:[%s2682_s22 + $0x98] sm:$0xff] %vm815_vm1, %v1486_v56 }
 0x2ec   : > { %1525 = vst [vmem:[%s2682_s22 + $0x80] sm:$0xff] %v1483_v46  ;;  %1526 = vst.msk [vmem:[%s2682_s22 + $0x88] sm:$0xff] %vm815_vm1, %v1484_v6  ;;  %v1445_v12 = vadd.f32 %v2656_v16, %v1298_v37  ;;  %v1446_v43 = vadd.f32 %v2656_v16, %v1299_v38  ;;  %v1231_v29 = vpop.permute.xlu0 %1230  ;;  %v2879_v6 = vld [vmem:[#allocation12_spill] sm:$0xff] }
 0x2ed   : > { %v1300_v27 = vmul.f32 %v1231_v29, %v2455_v7  ;;  %v1301_v61 = vmul.f32 %v1231_v29, %v2458_v9 }
 0x2ee   : > { %v1487_v5 = vmax.f32 %v1445_v12, 0.0  ;;  %v1488_v19 = vmax.f32 %v1446_v43, 0.0 }
 0x2ef   : > { %v1447_v59 = vadd.f32 %v2658_v41, %v1300_v27  ;;  %v1448_v32 = vadd.f32 %v2658_v41, %v1301_v61  ;;  %v2880_v27 = vld [vmem:[#allocation13_spill] sm:$0xff] }
 0x2f0   : > { %1529 = vst [vmem:[%s2682_s22 + $0xa0] sm:$0xff] %v1487_v5  ;;  %1530 = vst.msk [vmem:[%s2682_s22 + $0xa8] sm:$0xff] %vm815_vm1, %v1488_v19  ;;  %v1236_v62 = vpop.permute.xlu1 %1235  ;;  %v2881_v5 = vld [vmem:[#allocation14_spill] sm:$0xff] }
 0x2f1   : > { %v1489_v2 = vmax.f32 %v1447_v59, 0.0  ;;  %v1490_v16 = vmax.f32 %v1448_v32, 0.0  ;;  %v1302_v28 = vmul.f32 %v1236_v62, %v2466_v15  ;;  %v1303_v7 = vmul.f32 %v1236_v62, %v2869_v20  ;;  %v2883_v20 = vld [vmem:[#allocation16_spill] sm:$0xff] }
 0x2f3   : > { %1531 = vst [vmem:[%s2682_s22 + $0xb0] sm:$0xff] %v1489_v2  ;;  %1532 = vst.msk [vmem:[%s2682_s22 + $0xb8] sm:$0xff] %vm815_vm1, %v1490_v16  ;;  %v1449_v9 = vadd.f32 %v2660_v22, %v1302_v28  ;;  %v1450_v41 = vadd.f32 %v2660_v22, %v1303_v7 }
 0x2f4   : > { %v1241_v13 = vpop.permute.xlu0 %1240 }
 0x2f5   : > { %v1491_v24 = vmax.f32 %v1449_v9, 0.0  ;;  %v1492_v3 = vmax.f32 %v1450_v41, 0.0  ;;  %v1304_v8 = vmul.f32 %v1241_v13, %v2870_v47  ;;  %v1305_v39 = vmul.f32 %v1241_v13, %v2871_v1  ;;  %v2884_v47 = vld [vmem:[#allocation18_spill] sm:$0xff]  ;;  %v2885_v1 = vld [vmem:[#allocation17_spill] sm:$0xff] }
 0x2f7   : > { %1533 = vst [vmem:[%s2682_s22 + $0xc0] sm:$0xff] %v1491_v24  ;;  %1534 = vst.msk [vmem:[%s2682_s22 + $0xc8] sm:$0xff] %vm815_vm1, %v1492_v3  ;;  %v1451_v15 = vadd.f32 %v2662_v49, %v1304_v8  ;;  %v1452_v31 = vadd.f32 %v2662_v49, %v1305_v39 }
 0x2f8   : > { %v1246_v26 = vpop.permute.xlu1 %1245 }
 0x2f9   : > { %v1493_v63 = vmax.f32 %v1451_v15, 0.0  ;;  %v1494_v22 = vmax.f32 %v1452_v31, 0.0  ;;  %v1306_v14 = vmul.f32 %v1246_v26, %v2872_v35  ;;  %v1307_v52 = vmul.f32 %v1246_v26, %v2873_v4 }
 0x2fb   : > { %1535 = vst [vmem:[%s2682_s22 + $0xd0] sm:$0xff] %v1493_v63  ;;  %1536 = vst.msk [vmem:[%s2682_s22 + $0xd8] sm:$0xff] %vm815_vm1, %v1494_v22  ;;  %v1453_v48 = vadd.f32 %v2664_v0, %v1306_v14  ;;  %v1454_v11 = vadd.f32 %v2664_v0, %v1307_v52 }
 0x2fc   : > { %v1251_v17 = vpop.permute.xlu0 %1250 }
 0x2fd   : > { %v1495_v51 = vmax.f32 %v1453_v48, 0.0  ;;  %v1496_v49 = vmax.f32 %v1454_v11, 0.0  ;;  %v1308_v42 = vmul.f32 %v1251_v17, %v2874_v23  ;;  %v1309_v21 = vmul.f32 %v1251_v17, %v2875_v40 }
 0x2ff   : > { %1537 = vst [vmem:[%s2682_s22 + $0xe0] sm:$0xff] %v1495_v51  ;;  %1538 = vst.msk [vmem:[%s2682_s22 + $0xe8] sm:$0xff] %vm815_vm1, %v1496_v49  ;;  %v1455_v33 = vadd.f32 %v2666_v18, %v1308_v42  ;;  %v1456_v44 = vadd.f32 %v2666_v18, %v1309_v21 }
 0x300   : > { %v1256_v57 = vpop.permute.xlu1 %1255 }
 0x301   : > { %v1497_v60 = vmax.f32 %v1455_v33, 0.0  ;;  %v1498_v0 = vmax.f32 %v1456_v44, 0.0  ;;  %v1310_v30 = vmul.f32 %v1256_v57, %v2876_v10  ;;  %v1311_v45 = vmul.f32 %v1256_v57, %v2877_v34 }
 0x303   : > { %1539 = vst [vmem:[%s2682_s22 + $0xf0] sm:$0xff] %v1497_v60  ;;  %1540 = vst.msk [vmem:[%s2682_s22 + $0xf8] sm:$0xff] %vm815_vm1, %v1498_v0  ;;  %v1457_v53 = vadd.f32 %v2668_v25, %v1310_v30  ;;  %v1458_v50 = vadd.f32 %v2668_v25, %v1311_v45 }
 0x304   : > { %v1261_v55 = vpop.permute.xlu0 %1260 }
 0x305   : > { %v1499_v56 = vmax.f32 %v1457_v53, 0.0  ;;  %v1500_v18 = vmax.f32 %v1458_v50, 0.0  ;;  %v1312_v46 = vmul.f32 %v1261_v55, %v2878_v54  ;;  %v1313_v37 = vmul.f32 %v1261_v55, %v2879_v6 }
 0x307   : > { %1541 = vst [vmem:[%s2682_s22 + $0x100] sm:$0xff] %v1499_v56  ;;  %1542 = vst.msk [vmem:[%s2682_s22 + $0x108] sm:$0xff] %vm815_vm1, %v1500_v18  ;;  %v1459_v38 = vadd.f32 %v2670_v58, %v1312_v46  ;;  %v1460_v12 = vadd.f32 %v2670_v58, %v1313_v37  ;;  %v2882_v58 = vld [vmem:[#allocation15_spill] sm:$0xff] }
 0x308   : > { %v1266_v43 = vpop.permute.xlu1 %1265 }
 0x309   : > { %v1501_v29 = vmax.f32 %v1459_v38, 0.0  ;;  %v1502_v25 = vmax.f32 %v1460_v12, 0.0  ;;  %v1314_v61 = vmul.f32 %v1266_v43, %v2880_v27  ;;  %v1315_v19 = vmul.f32 %v1266_v43, %v2881_v5 }
 0x30b   : > { %1543 = vst [vmem:[%s2682_s22 + $0x110] sm:$0xff] %v1501_v29  ;;  %1544 = vst.msk [vmem:[%s2682_s22 + $0x118] sm:$0xff] %vm815_vm1, %v1502_v25  ;;  %v1461_v59 = vadd.f32 %v2672_v36, %v1314_v61  ;;  %v1462_v32 = vadd.f32 %v2672_v36, %v1315_v19 }
 0x30c   : > { %v1271_v62 = vpop.permute.xlu0 %1270 }
 0x30d   : > { %v1503_v2 = vmax.f32 %v1461_v59, 0.0  ;;  %v1504_v16 = vmax.f32 %v1462_v32, 0.0  ;;  %v1316_v28 = vmul.f32 %v1271_v62, %v2882_v58  ;;  %v1317_v7 = vmul.f32 %v1271_v62, %v2883_v20 }
 0x30f   : > { %1545 = vst [vmem:[%s2682_s22 + $0x120] sm:$0xff] %v1503_v2  ;;  %1546 = vst.msk [vmem:[%s2682_s22 + $0x128] sm:$0xff] %vm815_vm1, %v1504_v16 }
 0x311   : > { %v1418_v9 = vpop.permute.xlu0 %1417 }
 0x312   : > { %v1463_v41 = vadd.f32 %v1418_v9, %v1316_v28  ;;  %v1464_v13 = vadd.f32 %v1418_v9, %v1317_v7 }
 0x314   : > { %v1505_v24 = vmax.f32 %v1463_v41, 0.0  ;;  %v1506_v3 = vmax.f32 %v1464_v13, 0.0 }
 0x316   : > { %1547 = vst [vmem:[%s2682_s22 + $0x130] sm:$0xff] %v1505_v24  ;;  %1548 = vst.msk [vmem:[%s2682_s22 + $0x138] sm:$0xff] %vm815_vm1, %v1506_v3 }
 0x355   : > { %v1276_v36 = vpop.permute.xlu1 %1275 }
 0x356   : > { %v1318_v8 = vmul.f32 %v1276_v36, %v2884_v47  ;;  %v1319_v39 = vmul.f32 %v1276_v36, %v2885_v1 }
 0x35a   : > { %v1423_v15 = vpop.permute.xlu1 %1422 }
 0x35b   : > { %v1465_v31 = vadd.f32 %v1423_v15, %v1318_v8  ;;  %v1466_v26 = vadd.f32 %v1423_v15, %v1319_v39 }
 0x35d   : > { %v1507_v63 = vmax.f32 %v1465_v31, 0.0  ;;  %v1508_v22 = vmax.f32 %v1466_v26, 0.0 }
 0x35f   : > { %1549 = vst [vmem:[%s2682_s22 + $0x140] sm:$0xff] %v1507_v63  ;;  %1550 = vst.msk [vmem:[%s2682_s22 + $0x148] sm:$0xff] %vm815_vm1, %v1508_v22 }
 0x360 PF: > { %s13_s12 = sadd.s32 1, %s1723_s12  }
 0x361   : > { %p10_p4 = scmp.ge.s32.totalorder %s13_s12, 4  }
 0x363   :  { %12 = sbr.rel (!%p10_p4) target bundleno = 1 (0x1), region = 65 }

</bundles_post_ra>
